<compile_context>
chip_gen: v6e
topology: v6e:2x2x1
jax: 0.10.0
libtpu: 0.0.40
codegen_flags: <defaults>
</compile_context>

<pallas_src>
import functools

import numpy as np

import jax
import jax.numpy as jnp
from jax.experimental import pallas as pl
from jax.experimental.pallas import tpu as pltpu


# ----------------------------------------------------------------------------
# Kernel
# ----------------------------------------------------------------------------
def _policy_kernel(w_gates_ref, b_gates_ref, w_lin_ref, b_lin_ref, tri_ref,
                   rand_ref, prob_ref, act_ref, xh_ref, *,
                   batch, n_hidden, n_out, phu, layer_limit, training):
    """One grid step = full autoregressive rollout for one batch block."""
    B, H, O, T = batch, n_hidden, n_out, layer_limit

    # ---- hoisted loads / broadcasts (done once, not per unrolled step) ----
    w_i = w_gates_ref[0]                                  # (H+O, H)
    w_f = w_gates_ref[1]
    w_g = w_gates_ref[2]
    w_o = w_gates_ref[3]
    b_i = jnp.broadcast_to(b_gates_ref[0], (B, H))        # (B, H)
    b_f = jnp.broadcast_to(b_gates_ref[1], (B, H))
    b_g = jnp.broadcast_to(b_gates_ref[2], (B, H))
    b_o = jnp.broadcast_to(b_gates_ref[3], (B, H))
    w_lin = w_lin_ref[...]                                # (H, O)
    b_lin = jnp.broadcast_to(b_lin_ref[...], (B, O))      # (B, O)
    tri = tri_ref[...]                                    # (O, O) upper-tri ones

    col = jax.lax.broadcasted_iota(jnp.int32, (B, O), 1)
    col_t = jax.lax.broadcasted_iota(jnp.int32, (B, T), 1)
    neg = jnp.float32(-1e30)
    mask_even = jnp.where(col < phu, 0.0, neg)            # keep hidden-unit cols
    mask_odd = jnp.where(col >= phu, 0.0, neg)            # keep activation cols

    c = jnp.zeros((B, H), jnp.float32)
    xh_ref[...] = jnp.zeros((B, H + O), jnp.float32)      # persistent [h | x] input
    prob_acc = jnp.zeros((B, T), jnp.float32)
    act_acc = jnp.zeros((B, T), jnp.int32)

    # layer_limit is a small static Python int -> fully unrolled recurrence.
    for t in range(T):
        xh = xh_ref[...]                                  # (B, H+O)

        # ---- LSTMCell: one fused (B, H+O) @ (H+O, H) dot per gate (i,f,g,o) ----
        i_g = jax.nn.sigmoid(
            jnp.dot(xh, w_i, preferred_element_type=jnp.float32) + b_i)
        f_g = jax.nn.sigmoid(
            jnp.dot(xh, w_f, preferred_element_type=jnp.float32) + b_f)
        g_g = jnp.tanh(
            jnp.dot(xh, w_g, preferred_element_type=jnp.float32) + b_g)
        o_g = jax.nn.sigmoid(
            jnp.dot(xh, w_o, preferred_element_type=jnp.float32) + b_o)
        c = f_g * c + i_g * g_g
        h = o_g * jnp.tanh(c)

        # ---- linear + masked softmax (alternate mask fused into the logits) ----
        logits = jnp.dot(h, w_lin, preferred_element_type=jnp.float32) + b_lin
        logits = logits + (mask_even if t % 2 == 0 else mask_odd)
        m = jnp.max(logits, axis=1, keepdims=True)
        e = jnp.exp(logits - m)                           # masked cols underflow to 0
        out = e * pl.reciprocal(jnp.sum(e, axis=1, keepdims=True), approx=True)

        # ---- sample_action ----
        last_valid = (phu - 1) if t % 2 == 0 else (O - 1)
        if training:
            r = rand_ref[:, t:t + 1]                      # (B, 1)
            csum = jnp.dot(out, tri, preferred_element_type=jnp.float32)
            hit = csum > r
            first = jnp.min(jnp.where(hit, col, O), axis=1, keepdims=True)
            # FP-rounding fallback: clamp to the last valid column of this
            # step's mask (np.argmax-of-all-False -> 0 would break alternation).
            action = jnp.where(first == O, last_valid, first)
        else:
            mx = jnp.max(out, axis=1, keepdims=True)
            action = jnp.min(jnp.where(out == mx, col, O),
                             axis=1, keepdims=True)       # first argmax

        onehot = (col == action).astype(jnp.float32)      # (B, O)
        p = jnp.sum(onehot * out, axis=1, keepdims=True)  # out[b, action[b]]

        # accumulate (B, T) outputs in registers -> one dense store at the end
        sel = col_t == t
        prob_acc = jnp.where(sel, p, prob_acc)
        act_acc = jnp.where(sel, action, act_acc)

        # next-step LSTM input: [ h | one-hot(action) ]
        xh_ref[:, :H] = h
        xh_ref[:, H:H + O] = onehot

    prob_ref[...] = prob_acc
    act_ref[...] = act_acc


# ----------------------------------------------------------------------------
# Wrapper
# ----------------------------------------------------------------------------
def policy_net_forward(params, rand, *, batch, n_hidden, n_out, phu,
                       layer_limit, training, batch_block=None):
    """Returns (prob [B, T] float32, actions [B, T] float32)."""
    w_gates, b_gates, w_lin_t, b_lin, tri = params
    bb = batch if batch_block is None else batch_block
    assert batch % bb == 0
    assert bb == batch or bb % 8 == 0, "batch_block must be sublane (8) aligned"
    grid = (batch // bb,)

    kern = functools.partial(_policy_kernel, batch=bb, n_hidden=n_hidden,
                             n_out=n_out, phu=phu, layer_limit=layer_limit,
                             training=training)

    whole = lambda: pl.BlockSpec(memory_space=pltpu.MemorySpace.VMEM)
    row_block = lambda: pl.BlockSpec((bb, layer_limit), lambda i: (i, 0))

    prob, actions = pl.pallas_call(
        kern,
        out_shape=(jax.ShapeDtypeStruct((batch, layer_limit), jnp.float32),
                   jax.ShapeDtypeStruct((batch, layer_limit), jnp.int32)),
        grid=grid,
        in_specs=[whole(), whole(), whole(), whole(), whole(), row_block()],
        out_specs=(row_block(), row_block()),
        scratch_shapes=[pltpu.VMEM((bb, n_hidden + n_out), jnp.float32)],
        compiler_params=pltpu.CompilerParams(
            dimension_semantics=("parallel",)),     # batch blocks -> v7x 2 TCs
    )(w_gates, b_gates, w_lin_t, b_lin, tri, rand)
    # PyTorch returns `actions` as a float array of indices.
    return prob, actions.astype(jnp.float32)


# ----------------------------------------------------------------------------
# Parameter init / packing
# ----------------------------------------------------------------------------
def init_raw_params(key, n_hidden, n_out):
    """PyTorch-style init: U(-1/sqrt(H), 1/sqrt(H)), PyTorch layouts."""
    k = 1.0 / (float(n_hidden) ** 0.5)
    keys = jax.random.split(key, 6)
    u = lambda kk, shape: jax.random.uniform(kk, shape, jnp.float32, -k, k)
    w_ih = u(keys[0], (4 * n_hidden, n_out))      # lstm_1.weight_ih
    w_hh = u(keys[1], (4 * n_hidden, n_hidden))   # lstm_1.weight_hh
    b_ih = u(keys[2], (4 * n_hidden,))
    b_hh = u(keys[3], (4 * n_hidden,))
    w_lin = u(keys[4], (n_out, n_hidden))         # linear.weight
    b_lin = u(keys[5], (n_out,))
    return w_ih, w_hh, b_ih, b_hh, w_lin, b_lin


def pack_params(raw, n_hidden, n_out):
    """Re-lay weights for the kernel: per-gate, [h | x]-concatenated, transposed."""
    w_ih, w_hh, b_ih, b_hh, w_lin, b_lin = raw
    H = n_hidden
    b = b_ih + b_hh
    gw, gb = [], []
    for g in range(4):                            # PyTorch gate order: i, f, g, o
        w_x = w_ih[g * H:(g + 1) * H, :]          # (H, n_out)
        w_h = w_hh[g * H:(g + 1) * H, :]          # (H, H)
        gw.append(jnp.concatenate([w_h, w_x], axis=1).T)   # (H + n_out, H)
        gb.append(b[g * H:(g + 1) * H].reshape(1, H))
    w_gates = jnp.stack(gw, axis=0)               # (4, H + n_out, H)
    b_gates = jnp.stack(gb, axis=0)               # (4, 1, H)
    tri = (jnp.arange(n_out)[:, None]
           <= jnp.arange(n_out)[None, :]).astype(jnp.float32)   # cumsum matrix
    return (w_gates, b_gates, w_lin.T, b_lin.reshape(1, n_out), tri)


# ----------------------------------------------------------------------------
# Plain-JAX reference (mirrors the PyTorch math), conditioned on given actions
# ----------------------------------------------------------------------------
def reference_probs(raw_params, actions, phu, n_out, n_hidden):
    w_ih, w_hh, b_ih, b_hh, w_lin, b_lin = raw_params
    B, T = actions.shape
    H = n_hidden
    h = jnp.zeros((B, H), jnp.float32)
    c = jnp.zeros((B, H), jnp.float32)
    x = jnp.zeros((B, n_out), jnp.float32)
    cols = jnp.arange(n_out)
    probs = []
    for t in range(T):
        gates = x @ w_ih.T + h @ w_hh.T + b_ih + b_hh
        i_g = jax.nn.sigmoid(gates[:, 0:H])
        f_g = jax.nn.sigmoid(gates[:, H:2 * H])
        g_g = jnp.tanh(gates[:, 2 * H:3 * H])
        o_g = jax.nn.sigmoid(gates[:, 3 * H:4 * H])
        c = f_g * c + i_g * g_g
        h = o_g * jnp.tanh(c)
        out = jax.nn.softmax(h @ w_lin.T + b_lin, axis=1)
        keep = (cols < phu) if t % 2 == 0 else (cols >= phu)
        out = jnp.where(keep[None, :], out, 0.0)
        out = out / out.sum(axis=1, keepdims=True)
        a = actions[:, t]
        probs.append(out[jnp.arange(B), a])
        x = jax.nn.one_hot(a, n_out, dtype=jnp.float32)
    return jnp.stack(probs, axis=1)


# ----------------------------------------------------------------------------
if __name__ == "__main__":
    POSSIBLE_HIDDEN_UNITS = 8
    POSSIBLE_ACTIVATION_FUNCTIONS = 4
    N_OUT = POSSIBLE_HIDDEN_UNITS + POSSIBLE_ACTIVATION_FUNCTIONS   # 12
    N_HIDDEN = 24
    LAYER_LIMIT = 6
    BATCH = 16          # multiple of 8 (full f32 sublanes), 2 parallel blocks
    BATCH_BLOCK = 8

    key = jax.random.PRNGKey(0)
    pkey, rkey = jax.random.split(key)
    raw = init_raw_params(pkey, N_HIDDEN, N_OUT)
    params = pack_params(raw, N_HIDDEN, N_OUT)
    # one uniform draw per (row, step) -- replaces np.random.rand in sample_action
    rand = jax.random.uniform(rkey, (BATCH, LAYER_LIMIT), jnp.float32)

    for training in (True, False):
        prob, actions = policy_net_forward(
            params, rand, batch=BATCH, n_hidden=N_HIDDEN, n_out=N_OUT,
            phu=POSSIBLE_HIDDEN_UNITS, layer_limit=LAYER_LIMIT,
            training=training, batch_block=BATCH_BLOCK)
        prob = jax.block_until_ready(prob)
        actions = jax.block_until_ready(actions)

        assert prob.shape == (BATCH, LAYER_LIMIT)
        assert actions.shape == (BATCH, LAYER_LIMIT)
        p = np.asarray(jax.device_get(prob))
        a = np.asarray(jax.device_get(actions)).astype(np.int32)
        assert (p > 0.0).all() and (p <= 1.0 + 1e-2).all()
        for t in range(LAYER_LIMIT):
            if t % 2 == 0:   # even step: only hidden-unit actions are valid
                assert ((a[:, t] >= 0) & (a[:, t] < POSSIBLE_HIDDEN_UNITS)).all()
            else:            # odd step: only activation-fn actions are valid
                assert ((a[:, t] >= POSSIBLE_HIDDEN_UNITS) & (a[:, t] < N_OUT)).all()

        # probabilities must match the PyTorch-style math (softmax -> mask ->
        # renorm) conditioned on the kernel's action trajectory.
        ref_p = np.asarray(jax.device_get(reference_probs(
            raw, jnp.asarray(a), POSSIBLE_HIDDEN_UNITS, N_OUT, N_HIDDEN)))
        assert np.allclose(p, ref_p, rtol=1e-2, atol=1e-6), float(
            np.max(np.abs(p - ref_p)))

    print("KERNEL_OK")
</pallas_src>

<mosaic_0001>
module attributes {stable_mosaic.version = 11 : i64} {
  func.func @_policy_kernel(%arg0: i32, %arg1: memref<4x36x24xf32, #tpu.memory_space<vmem>>, %arg2: memref<4x1x24xf32, #tpu.memory_space<vmem>>, %arg3: memref<24x12xf32, #tpu.memory_space<vmem>>, %arg4: memref<1x12xf32, #tpu.memory_space<vmem>>, %arg5: memref<12x12xf32, #tpu.memory_space<vmem>>, %arg6: memref<8x6xf32, #tpu.memory_space<vmem>>, %arg7: memref<8x6xf32, #tpu.memory_space<vmem>>, %arg8: memref<8x6xi32, #tpu.memory_space<vmem>>, %arg9: memref<8x36xf32, #tpu.memory_space<vmem>>) attributes {dimension_semantics = [#tpu.dimension_semantics<parallel>], iteration_bounds = array<i64: 2>, scalar_prefetch = 0 : i64, scratch_operands = 1 : i64, tpu.core_type = #tpu.core_type<tc>, window_params = [{pipeline_mode = #tpu.pipeline_mode<synchronous>, transform_indices = @transform_0, window_bounds = array<i64: 4, 36, 24>}, {pipeline_mode = #tpu.pipeline_mode<synchronous>, transform_indices = @transform_1, window_bounds = array<i64: 4, 1, 24>}, {pipeline_mode = #tpu.pipeline_mode<synchronous>, transform_indices = @transform_2, window_bounds = array<i64: 24, 12>}, {pipeline_mode = #tpu.pipeline_mode<synchronous>, transform_indices = @transform_3, window_bounds = array<i64: 1, 12>}, {pipeline_mode = #tpu.pipeline_mode<synchronous>, transform_indices = @transform_4, window_bounds = array<i64: 12, 12>}, {transform_indices = @transform_5, window_bounds = array<i64: 8, 6>}, {transform_indices = @transform_6, window_bounds = array<i64: 8, 6>}, {transform_indices = @transform_7, window_bounds = array<i64: 8, 6>}]} {
    %c0 = arith.constant 0 : index
    %c0_0 = arith.constant 0 : index
    %c0_1 = arith.constant 0 : index
    %0 = vector.load %arg1[%c0, %c0_0, %c0_1] : memref<4x36x24xf32, #tpu.memory_space<vmem>>, vector<1x36x24xf32>
    %1 = vector.shape_cast %0 : vector<1x36x24xf32> to vector<36x24xf32>
    %c1 = arith.constant 1 : index
    %c0_2 = arith.constant 0 : index
    %c0_3 = arith.constant 0 : index
    %2 = vector.load %arg1[%c1, %c0_2, %c0_3] : memref<4x36x24xf32, #tpu.memory_space<vmem>>, vector<1x36x24xf32>
    %3 = vector.shape_cast %2 : vector<1x36x24xf32> to vector<36x24xf32>
    %c2 = arith.constant 2 : index
    %c0_4 = arith.constant 0 : index
    %c0_5 = arith.constant 0 : index
    %4 = vector.load %arg1[%c2, %c0_4, %c0_5] : memref<4x36x24xf32, #tpu.memory_space<vmem>>, vector<1x36x24xf32>
    %5 = vector.shape_cast %4 : vector<1x36x24xf32> to vector<36x24xf32>
    %c3 = arith.constant 3 : index
    %c0_6 = arith.constant 0 : index
    %c0_7 = arith.constant 0 : index
    %6 = vector.load %arg1[%c3, %c0_6, %c0_7] : memref<4x36x24xf32, #tpu.memory_space<vmem>>, vector<1x36x24xf32>
    %7 = vector.shape_cast %6 : vector<1x36x24xf32> to vector<36x24xf32>
    %c0_8 = arith.constant 0 : index
    %c0_9 = arith.constant 0 : index
    %c0_10 = arith.constant 0 : index
    %8 = vector.load %arg2[%c0_8, %c0_9, %c0_10] : memref<4x1x24xf32, #tpu.memory_space<vmem>>, vector<1x1x24xf32>
    %9 = vector.shape_cast %8 : vector<1x1x24xf32> to vector<1x24xf32>
    %10 = vector.shape_cast %9 : vector<1x24xf32> to vector<1x24xf32>
    %11 = vector.broadcast %10 : vector<1x24xf32> to vector<8x24xf32>
    %c1_11 = arith.constant 1 : index
    %c0_12 = arith.constant 0 : index
    %c0_13 = arith.constant 0 : index
    %12 = vector.load %arg2[%c1_11, %c0_12, %c0_13] : memref<4x1x24xf32, #tpu.memory_space<vmem>>, vector<1x1x24xf32>
    %13 = vector.shape_cast %12 : vector<1x1x24xf32> to vector<1x24xf32>
    %14 = vector.shape_cast %13 : vector<1x24xf32> to vector<1x24xf32>
    %15 = vector.broadcast %14 : vector<1x24xf32> to vector<8x24xf32>
    %c2_14 = arith.constant 2 : index
    %c0_15 = arith.constant 0 : index
    %c0_16 = arith.constant 0 : index
    %16 = vector.load %arg2[%c2_14, %c0_15, %c0_16] : memref<4x1x24xf32, #tpu.memory_space<vmem>>, vector<1x1x24xf32>
    %17 = vector.shape_cast %16 : vector<1x1x24xf32> to vector<1x24xf32>
    %18 = vector.shape_cast %17 : vector<1x24xf32> to vector<1x24xf32>
    %19 = vector.broadcast %18 : vector<1x24xf32> to vector<8x24xf32>
    %c3_17 = arith.constant 3 : index
    %c0_18 = arith.constant 0 : index
    %c0_19 = arith.constant 0 : index
    %20 = vector.load %arg2[%c3_17, %c0_18, %c0_19] : memref<4x1x24xf32, #tpu.memory_space<vmem>>, vector<1x1x24xf32>
    %21 = vector.shape_cast %20 : vector<1x1x24xf32> to vector<1x24xf32>
    %22 = vector.shape_cast %21 : vector<1x24xf32> to vector<1x24xf32>
    %23 = vector.broadcast %22 : vector<1x24xf32> to vector<8x24xf32>
    %c0_20 = arith.constant 0 : index
    %c0_21 = arith.constant 0 : index
    %24 = vector.load %arg3[%c0_20, %c0_21] : memref<24x12xf32, #tpu.memory_space<vmem>>, vector<24x12xf32>
    %c0_22 = arith.constant 0 : index
    %c0_23 = arith.constant 0 : index
    %25 = vector.load %arg4[%c0_22, %c0_23] : memref<1x12xf32, #tpu.memory_space<vmem>>, vector<1x12xf32>
    %26 = vector.shape_cast %25 : vector<1x12xf32> to vector<1x12xf32>
    %27 = vector.broadcast %26 : vector<1x12xf32> to vector<8x12xf32>
    %c0_24 = arith.constant 0 : index
    %c0_25 = arith.constant 0 : index
    %28 = vector.load %arg5[%c0_24, %c0_25] : memref<12x12xf32, #tpu.memory_space<vmem>>, vector<12x12xf32>
    %29 = tpu.iota {dimensions = array<i32: 1>} : vector<8x12xi32>
    %30 = tpu.iota {dimensions = array<i32: 1>} : vector<8x6xi32>
    %c8_i32 = arith.constant 8 : i32
    %31 = vector.broadcast %c8_i32 : i32 to vector<8x12xi32>
    %32 = arith.cmpi slt, %29, %31 : vector<8x12xi32>
    %cst = arith.constant 0.000000e+00 : f32
    %cst_26 = arith.constant -1.000000e+30 : f32
    %33 = vector.broadcast %cst : f32 to vector<8x12xf32>
    %34 = vector.broadcast %cst_26 : f32 to vector<8x12xf32>
    %35 = arith.select %32, %33, %34 : vector<8x12xi1>, vector<8x12xf32>
    %c8_i32_27 = arith.constant 8 : i32
    %36 = vector.broadcast %c8_i32_27 : i32 to vector<8x12xi32>
    %37 = arith.cmpi sge, %29, %36 : vector<8x12xi32>
    %cst_28 = arith.constant 0.000000e+00 : f32
    %cst_29 = arith.constant -1.000000e+30 : f32
    %38 = vector.broadcast %cst_28 : f32 to vector<8x12xf32>
    %39 = vector.broadcast %cst_29 : f32 to vector<8x12xf32>
    %40 = arith.select %37, %38, %39 : vector<8x12xi1>, vector<8x12xf32>
    %cst_30 = arith.constant 0.000000e+00 : f32
    %41 = vector.broadcast %cst_30 : f32 to vector<8x24xf32>
    %cst_31 = arith.constant 0.000000e+00 : f32
    %42 = vector.broadcast %cst_31 : f32 to vector<8x36xf32>
    %c0_32 = arith.constant 0 : index
    %c0_33 = arith.constant 0 : index
    %43 = vector.load %arg9[%c0_32, %c0_33] : memref<8x36xf32, #tpu.memory_space<vmem>>, vector<8x36xf32>
    tpu.vector_store %arg9[%c0_32, %c0_33], %42 {strides = array<i32>} : memref<8x36xf32, #tpu.memory_space<vmem>>, vector<8x36xf32>,
    %cst_34 = arith.constant 0.000000e+00 : f32
    %44 = vector.broadcast %cst_34 : f32 to vector<8x6xf32>
    %c0_i32 = arith.constant 0 : i32
    %45 = vector.broadcast %c0_i32 : i32 to vector<8x6xi32>
    %c0_35 = arith.constant 0 : index
    %c0_36 = arith.constant 0 : index
    %46 = vector.load %arg9[%c0_35, %c0_36] : memref<8x36xf32, #tpu.memory_space<vmem>>, vector<8x36xf32>
    %cst_37 = arith.constant dense<0.000000e+00> : vector<8x24xf32>
    %47 = tpu.matmul %46, %1, %cst_37 {dimension_numbers = #tpu.dot_dimension_numbers<[1], [0], [0], [1], [0, 0, 1, 1], [], []>} : vector<8x36xf32>, vector<36x24xf32>, vector<8x24xf32> -> vector<8x24xf32>
    %48 = arith.addf %47, %11 : vector<8x24xf32>
    %49 = arith.negf %48 : vector<8x24xf32>
    %50 = math.exp %49 : vector<8x24xf32>
    %cst_38 = arith.constant 1.000000e+00 : f32
    %51 = vector.broadcast %cst_38 : f32 to vector<8x24xf32>
    %52 = arith.addf %51, %50 : vector<8x24xf32>
    %53 = arith.divf %51, %52 : vector<8x24xf32>
    %cst_39 = arith.constant dense<0.000000e+00> : vector<8x24xf32>
    %54 = tpu.matmul %46, %3, %cst_39 {dimension_numbers = #tpu.dot_dimension_numbers<[1], [0], [0], [1], [0, 0, 1, 1], [], []>} : vector<8x36xf32>, vector<36x24xf32>, vector<8x24xf32> -> vector<8x24xf32>
    %55 = arith.addf %54, %15 : vector<8x24xf32>
    %56 = arith.negf %55 : vector<8x24xf32>
    %57 = math.exp %56 : vector<8x24xf32>
    %cst_40 = arith.constant 1.000000e+00 : f32
    %58 = vector.broadcast %cst_40 : f32 to vector<8x24xf32>
    %59 = arith.addf %58, %57 : vector<8x24xf32>
    %60 = arith.divf %58, %59 : vector<8x24xf32>
    %cst_41 = arith.constant dense<0.000000e+00> : vector<8x24xf32>
    %61 = tpu.matmul %46, %5, %cst_41 {dimension_numbers = #tpu.dot_dimension_numbers<[1], [0], [0], [1], [0, 0, 1, 1], [], []>} : vector<8x36xf32>, vector<36x24xf32>, vector<8x24xf32> -> vector<8x24xf32>
    %62 = arith.addf %61, %19 : vector<8x24xf32>
    %63 = math.tanh %62 : vector<8x24xf32>
    %cst_42 = arith.constant dense<0.000000e+00> : vector<8x24xf32>
    %64 = tpu.matmul %46, %7, %cst_42 {dimension_numbers = #tpu.dot_dimension_numbers<[1], [0], [0], [1], [0, 0, 1, 1], [], []>} : vector<8x36xf32>, vector<36x24xf32>, vector<8x24xf32> -> vector<8x24xf32>
    %65 = arith.addf %64, %23 : vector<8x24xf32>
    %66 = arith.negf %65 : vector<8x24xf32>
    %67 = math.exp %66 : vector<8x24xf32>
    %cst_43 = arith.constant 1.000000e+00 : f32
    %68 = vector.broadcast %cst_43 : f32 to vector<8x24xf32>
    %69 = arith.addf %68, %67 : vector<8x24xf32>
    %70 = arith.divf %68, %69 : vector<8x24xf32>
    %71 = arith.mulf %60, %41 : vector<8x24xf32>
    %72 = arith.mulf %53, %63 : vector<8x24xf32>
    %73 = arith.addf %71, %72 : vector<8x24xf32>
    %74 = math.tanh %73 : vector<8x24xf32>
    %75 = arith.mulf %70, %74 : vector<8x24xf32>
    %cst_44 = arith.constant dense<0.000000e+00> : vector<8x12xf32>
    %76 = tpu.matmul %75, %24, %cst_44 {dimension_numbers = #tpu.dot_dimension_numbers<[1], [0], [0], [1], [0, 0, 1, 1], [], []>} : vector<8x24xf32>, vector<24x12xf32>, vector<8x12xf32> -> vector<8x12xf32>
    %77 = arith.addf %76, %27 : vector<8x12xf32>
    %78 = arith.addf %77, %35 : vector<8x12xf32>
    %cst_45 = arith.constant dense<0xFF800000> : vector<8xf32>
    %79 = vector.multi_reduction <maximumf>, %78, %cst_45 [1] : vector<8x12xf32> to vector<8xf32>
    %80 = vector.shape_cast %79 : vector<8xf32> to vector<8x1xf32>
    %81 = vector.broadcast %80 : vector<8x1xf32> to vector<8x12xf32>
    %82 = arith.subf %78, %81 : vector<8x12xf32>
    %83 = math.exp %82 : vector<8x12xf32>
    %cst_46 = arith.constant dense<0.000000e+00> : vector<8xf32>
    %84 = vector.multi_reduction <add>, %83, %cst_46 [1] : vector<8x12xf32> to vector<8xf32>
    %85 = vector.shape_cast %84 : vector<8xf32> to vector<8x1xf32>
    %86 = tpu.reciprocal %85 {approx = true} : vector<8x1xf32> -> vector<8x1xf32>
    %87 = vector.broadcast %86 : vector<8x1xf32> to vector<8x12xf32>
    %88 = arith.mulf %83, %87 : vector<8x12xf32>
    %c0_47 = arith.constant 0 : index
    %c0_48 = arith.constant 0 : index
    %89 = vector.load %arg6[%c0_47, %c0_48] : memref<8x6xf32, #tpu.memory_space<vmem>>, vector<8x1xf32>
    %cst_49 = arith.constant dense<0.000000e+00> : vector<8x12xf32>
    %90 = tpu.matmul %88, %28, %cst_49 {dimension_numbers = #tpu.dot_dimension_numbers<[1], [0], [0], [1], [0, 0, 1, 1], [], []>} : vector<8x12xf32>, vector<12x12xf32>, vector<8x12xf32> -> vector<8x12xf32>
    %91 = vector.broadcast %89 : vector<8x1xf32> to vector<8x12xf32>
    %92 = arith.cmpf ogt, %90, %91 : vector<8x12xf32>
    %c12_i32 = arith.constant 12 : i32
    %93 = vector.broadcast %c12_i32 : i32 to vector<8x12xi32>
    %94 = arith.select %92, %29, %93 : vector<8x12xi1>, vector<8x12xi32>
    %cst_50 = arith.constant dense<2147483647> : vector<8xi32>
    %95 = vector.multi_reduction <minsi>, %94, %cst_50 [1] : vector<8x12xi32> to vector<8xi32>
    %96 = vector.shape_cast %95 : vector<8xi32> to vector<8x1xi32>
    %c12_i32_51 = arith.constant 12 : i32
    %97 = vector.broadcast %c12_i32_51 : i32 to vector<8x1xi32>
    %98 = arith.cmpi eq, %96, %97 : vector<8x1xi32>
    %c7_i32 = arith.constant 7 : i32
    %99 = vector.broadcast %c7_i32 : i32 to vector<8x1xi32>
    %100 = arith.select %98, %99, %96 : vector<8x1xi1>, vector<8x1xi32>
    %101 = vector.broadcast %100 : vector<8x1xi32> to vector<8x12xi32>
    %102 = arith.cmpi eq, %29, %101 : vector<8x12xi32>
    %103 = arith.extui %102 : vector<8x12xi1> to vector<8x12xi32>
    %104 = arith.sitofp %103 : vector<8x12xi32> to vector<8x12xf32>
    %105 = arith.mulf %104, %88 : vector<8x12xf32>
    %cst_52 = arith.constant dense<0.000000e+00> : vector<8xf32>
    %106 = vector.multi_reduction <add>, %105, %cst_52 [1] : vector<8x12xf32> to vector<8xf32>
    %107 = vector.shape_cast %106 : vector<8xf32> to vector<8x1xf32>
    %c0_i32_53 = arith.constant 0 : i32
    %108 = vector.broadcast %c0_i32_53 : i32 to vector<8x6xi32>
    %109 = arith.cmpi eq, %30, %108 : vector<8x6xi32>
    %110 = vector.shape_cast %107 : vector<8x1xf32> to vector<8x1xf32>
    %111 = vector.broadcast %110 : vector<8x1xf32> to vector<8x6xf32>
    %112 = arith.select %109, %111, %44 : vector<8x6xi1>, vector<8x6xf32>
    %113 = vector.shape_cast %100 : vector<8x1xi32> to vector<8x1xi32>
    %114 = vector.broadcast %113 : vector<8x1xi32> to vector<8x6xi32>
    %115 = arith.select %109, %114, %45 : vector<8x6xi1>, vector<8x6xi32>
    %c0_54 = arith.constant 0 : index
    %c0_55 = arith.constant 0 : index
    %116 = vector.load %arg9[%c0_54, %c0_55] : memref<8x36xf32, #tpu.memory_space<vmem>>, vector<8x24xf32>
    tpu.vector_store %arg9[%c0_54, %c0_55], %75 {strides = array<i32>} : memref<8x36xf32, #tpu.memory_space<vmem>>, vector<8x24xf32>,
    %c0_56 = arith.constant 0 : index
    %c24 = arith.constant 24 : index
    %117 = vector.load %arg9[%c0_56, %c24] : memref<8x36xf32, #tpu.memory_space<vmem>>, vector<8x12xf32>
    tpu.vector_store %arg9[%c0_56, %c24], %104 {strides = array<i32>} : memref<8x36xf32, #tpu.memory_space<vmem>>, vector<8x12xf32>,
    %c0_57 = arith.constant 0 : index
    %c0_58 = arith.constant 0 : index
    %118 = vector.load %arg9[%c0_57, %c0_58] : memref<8x36xf32, #tpu.memory_space<vmem>>, vector<8x36xf32>
    %cst_59 = arith.constant dense<0.000000e+00> : vector<8x24xf32>
    %119 = tpu.matmul %118, %1, %cst_59 {dimension_numbers = #tpu.dot_dimension_numbers<[1], [0], [0], [1], [0, 0, 1, 1], [], []>} : vector<8x36xf32>, vector<36x24xf32>, vector<8x24xf32> -> vector<8x24xf32>
    %120 = arith.addf %119, %11 : vector<8x24xf32>
    %121 = arith.negf %120 : vector<8x24xf32>
    %122 = math.exp %121 : vector<8x24xf32>
    %cst_60 = arith.constant 1.000000e+00 : f32
    %123 = vector.broadcast %cst_60 : f32 to vector<8x24xf32>
    %124 = arith.addf %123, %122 : vector<8x24xf32>
    %125 = arith.divf %123, %124 : vector<8x24xf32>
    %cst_61 = arith.constant dense<0.000000e+00> : vector<8x24xf32>
    %126 = tpu.matmul %118, %3, %cst_61 {dimension_numbers = #tpu.dot_dimension_numbers<[1], [0], [0], [1], [0, 0, 1, 1], [], []>} : vector<8x36xf32>, vector<36x24xf32>, vector<8x24xf32> -> vector<8x24xf32>
    %127 = arith.addf %126, %15 : vector<8x24xf32>
    %128 = arith.negf %127 : vector<8x24xf32>
    %129 = math.exp %128 : vector<8x24xf32>
    %cst_62 = arith.constant 1.000000e+00 : f32
    %130 = vector.broadcast %cst_62 : f32 to vector<8x24xf32>
    %131 = arith.addf %130, %129 : vector<8x24xf32>
    %132 = arith.divf %130, %131 : vector<8x24xf32>
    %cst_63 = arith.constant dense<0.000000e+00> : vector<8x24xf32>
    %133 = tpu.matmul %118, %5, %cst_63 {dimension_numbers = #tpu.dot_dimension_numbers<[1], [0], [0], [1], [0, 0, 1, 1], [], []>} : vector<8x36xf32>, vector<36x24xf32>, vector<8x24xf32> -> vector<8x24xf32>
    %134 = arith.addf %133, %19 : vector<8x24xf32>
    %135 = math.tanh %134 : vector<8x24xf32>
    %cst_64 = arith.constant dense<0.000000e+00> : vector<8x24xf32>
    %136 = tpu.matmul %118, %7, %cst_64 {dimension_numbers = #tpu.dot_dimension_numbers<[1], [0], [0], [1], [0, 0, 1, 1], [], []>} : vector<8x36xf32>, vector<36x24xf32>, vector<8x24xf32> -> vector<8x24xf32>
    %137 = arith.addf %136, %23 : vector<8x24xf32>
    %138 = arith.negf %137 : vector<8x24xf32>
    %139 = math.exp %138 : vector<8x24xf32>
    %cst_65 = arith.constant 1.000000e+00 : f32
    %140 = vector.broadcast %cst_65 : f32 to vector<8x24xf32>
    %141 = arith.addf %140, %139 : vector<8x24xf32>
    %142 = arith.divf %140, %141 : vector<8x24xf32>
    %143 = arith.mulf %132, %73 : vector<8x24xf32>
    %144 = arith.mulf %125, %135 : vector<8x24xf32>
    %145 = arith.addf %143, %144 : vector<8x24xf32>
    %146 = math.tanh %145 : vector<8x24xf32>
    %147 = arith.mulf %142, %146 : vector<8x24xf32>
    %cst_66 = arith.constant dense<0.000000e+00> : vector<8x12xf32>
    %148 = tpu.matmul %147, %24, %cst_66 {dimension_numbers = #tpu.dot_dimension_numbers<[1], [0], [0], [1], [0, 0, 1, 1], [], []>} : vector<8x24xf32>, vector<24x12xf32>, vector<8x12xf32> -> vector<8x12xf32>
    %149 = arith.addf %148, %27 : vector<8x12xf32>
    %150 = arith.addf %149, %40 : vector<8x12xf32>
    %cst_67 = arith.constant dense<0xFF800000> : vector<8xf32>
    %151 = vector.multi_reduction <maximumf>, %150, %cst_67 [1] : vector<8x12xf32> to vector<8xf32>
    %152 = vector.shape_cast %151 : vector<8xf32> to vector<8x1xf32>
    %153 = vector.broadcast %152 : vector<8x1xf32> to vector<8x12xf32>
    %154 = arith.subf %150, %153 : vector<8x12xf32>
    %155 = math.exp %154 : vector<8x12xf32>
    %cst_68 = arith.constant dense<0.000000e+00> : vector<8xf32>
    %156 = vector.multi_reduction <add>, %155, %cst_68 [1] : vector<8x12xf32> to vector<8xf32>
    %157 = vector.shape_cast %156 : vector<8xf32> to vector<8x1xf32>
    %158 = tpu.reciprocal %157 {approx = true} : vector<8x1xf32> -> vector<8x1xf32>
    %159 = vector.broadcast %158 : vector<8x1xf32> to vector<8x12xf32>
    %160 = arith.mulf %155, %159 : vector<8x12xf32>
    %c0_69 = arith.constant 0 : index
    %c1_70 = arith.constant 1 : index
    %161 = vector.load %arg6[%c0_69, %c1_70] : memref<8x6xf32, #tpu.memory_space<vmem>>, vector<8x1xf32>
    %cst_71 = arith.constant dense<0.000000e+00> : vector<8x12xf32>
    %162 = tpu.matmul %160, %28, %cst_71 {dimension_numbers = #tpu.dot_dimension_numbers<[1], [0], [0], [1], [0, 0, 1, 1], [], []>} : vector<8x12xf32>, vector<12x12xf32>, vector<8x12xf32> -> vector<8x12xf32>
    %163 = vector.broadcast %161 : vector<8x1xf32> to vector<8x12xf32>
    %164 = arith.cmpf ogt, %162, %163 : vector<8x12xf32>
    %c12_i32_72 = arith.constant 12 : i32
    %165 = vector.broadcast %c12_i32_72 : i32 to vector<8x12xi32>
    %166 = arith.select %164, %29, %165 : vector<8x12xi1>, vector<8x12xi32>
    %cst_73 = arith.constant dense<2147483647> : vector<8xi32>
    %167 = vector.multi_reduction <minsi>, %166, %cst_73 [1] : vector<8x12xi32> to vector<8xi32>
    %168 = vector.shape_cast %167 : vector<8xi32> to vector<8x1xi32>
    %c12_i32_74 = arith.constant 12 : i32
    %169 = vector.broadcast %c12_i32_74 : i32 to vector<8x1xi32>
    %170 = arith.cmpi eq, %168, %169 : vector<8x1xi32>
    %c11_i32 = arith.constant 11 : i32
    %171 = vector.broadcast %c11_i32 : i32 to vector<8x1xi32>
    %172 = arith.select %170, %171, %168 : vector<8x1xi1>, vector<8x1xi32>
    %173 = vector.broadcast %172 : vector<8x1xi32> to vector<8x12xi32>
    %174 = arith.cmpi eq, %29, %173 : vector<8x12xi32>
    %175 = arith.extui %174 : vector<8x12xi1> to vector<8x12xi32>
    %176 = arith.sitofp %175 : vector<8x12xi32> to vector<8x12xf32>
    %177 = arith.mulf %176, %160 : vector<8x12xf32>
    %cst_75 = arith.constant dense<0.000000e+00> : vector<8xf32>
    %178 = vector.multi_reduction <add>, %177, %cst_75 [1] : vector<8x12xf32> to vector<8xf32>
    %179 = vector.shape_cast %178 : vector<8xf32> to vector<8x1xf32>
    %c1_i32 = arith.constant 1 : i32
    %180 = vector.broadcast %c1_i32 : i32 to vector<8x6xi32>
    %181 = arith.cmpi eq, %30, %180 : vector<8x6xi32>
    %182 = vector.shape_cast %179 : vector<8x1xf32> to vector<8x1xf32>
    %183 = vector.broadcast %182 : vector<8x1xf32> to vector<8x6xf32>
    %184 = arith.select %181, %183, %112 : vector<8x6xi1>, vector<8x6xf32>
    %185 = vector.shape_cast %172 : vector<8x1xi32> to vector<8x1xi32>
    %186 = vector.broadcast %185 : vector<8x1xi32> to vector<8x6xi32>
    %187 = arith.select %181, %186, %115 : vector<8x6xi1>, vector<8x6xi32>
    %c0_76 = arith.constant 0 : index
    %c0_77 = arith.constant 0 : index
    %188 = vector.load %arg9[%c0_76, %c0_77] : memref<8x36xf32, #tpu.memory_space<vmem>>, vector<8x24xf32>
    tpu.vector_store %arg9[%c0_76, %c0_77], %147 {strides = array<i32>} : memref<8x36xf32, #tpu.memory_space<vmem>>, vector<8x24xf32>,
    %c0_78 = arith.constant 0 : index
    %c24_79 = arith.constant 24 : index
    %189 = vector.load %arg9[%c0_78, %c24_79] : memref<8x36xf32, #tpu.memory_space<vmem>>, vector<8x12xf32>
    tpu.vector_store %arg9[%c0_78, %c24_79], %176 {strides = array<i32>} : memref<8x36xf32, #tpu.memory_space<vmem>>, vector<8x12xf32>,
    %c0_80 = arith.constant 0 : index
    %c0_81 = arith.constant 0 : index
    %190 = vector.load %arg9[%c0_80, %c0_81] : memref<8x36xf32, #tpu.memory_space<vmem>>, vector<8x36xf32>
    %cst_82 = arith.constant dense<0.000000e+00> : vector<8x24xf32>
    %191 = tpu.matmul %190, %1, %cst_82 {dimension_numbers = #tpu.dot_dimension_numbers<[1], [0], [0], [1], [0, 0, 1, 1], [], []>} : vector<8x36xf32>, vector<36x24xf32>, vector<8x24xf32> -> vector<8x24xf32>
    %192 = arith.addf %191, %11 : vector<8x24xf32>
    %193 = arith.negf %192 : vector<8x24xf32>
    %194 = math.exp %193 : vector<8x24xf32>
    %cst_83 = arith.constant 1.000000e+00 : f32
    %195 = vector.broadcast %cst_83 : f32 to vector<8x24xf32>
    %196 = arith.addf %195, %194 : vector<8x24xf32>
    %197 = arith.divf %195, %196 : vector<8x24xf32>
    %cst_84 = arith.constant dense<0.000000e+00> : vector<8x24xf32>
    %198 = tpu.matmul %190, %3, %cst_84 {dimension_numbers = #tpu.dot_dimension_numbers<[1], [0], [0], [1], [0, 0, 1, 1], [], []>} : vector<8x36xf32>, vector<36x24xf32>, vector<8x24xf32> -> vector<8x24xf32>
    %199 = arith.addf %198, %15 : vector<8x24xf32>
    %200 = arith.negf %199 : vector<8x24xf32>
    %201 = math.exp %200 : vector<8x24xf32>
    %cst_85 = arith.constant 1.000000e+00 : f32
    %202 = vector.broadcast %cst_85 : f32 to vector<8x24xf32>
    %203 = arith.addf %202, %201 : vector<8x24xf32>
    %204 = arith.divf %202, %203 : vector<8x24xf32>
    %cst_86 = arith.constant dense<0.000000e+00> : vector<8x24xf32>
    %205 = tpu.matmul %190, %5, %cst_86 {dimension_numbers = #tpu.dot_dimension_numbers<[1], [0], [0], [1], [0, 0, 1, 1], [], []>} : vector<8x36xf32>, vector<36x24xf32>, vector<8x24xf32> -> vector<8x24xf32>
    %206 = arith.addf %205, %19 : vector<8x24xf32>
    %207 = math.tanh %206 : vector<8x24xf32>
    %cst_87 = arith.constant dense<0.000000e+00> : vector<8x24xf32>
    %208 = tpu.matmul %190, %7, %cst_87 {dimension_numbers = #tpu.dot_dimension_numbers<[1], [0], [0], [1], [0, 0, 1, 1], [], []>} : vector<8x36xf32>, vector<36x24xf32>, vector<8x24xf32> -> vector<8x24xf32>
    %209 = arith.addf %208, %23 : vector<8x24xf32>
    %210 = arith.negf %209 : vector<8x24xf32>
    %211 = math.exp %210 : vector<8x24xf32>
    %cst_88 = arith.constant 1.000000e+00 : f32
    %212 = vector.broadcast %cst_88 : f32 to vector<8x24xf32>
    %213 = arith.addf %212, %211 : vector<8x24xf32>
    %214 = arith.divf %212, %213 : vector<8x24xf32>
    %215 = arith.mulf %204, %145 : vector<8x24xf32>
    %216 = arith.mulf %197, %207 : vector<8x24xf32>
    %217 = arith.addf %215, %216 : vector<8x24xf32>
    %218 = math.tanh %217 : vector<8x24xf32>
    %219 = arith.mulf %214, %218 : vector<8x24xf32>
    %cst_89 = arith.constant dense<0.000000e+00> : vector<8x12xf32>
    %220 = tpu.matmul %219, %24, %cst_89 {dimension_numbers = #tpu.dot_dimension_numbers<[1], [0], [0], [1], [0, 0, 1, 1], [], []>} : vector<8x24xf32>, vector<24x12xf32>, vector<8x12xf32> -> vector<8x12xf32>
    %221 = arith.addf %220, %27 : vector<8x12xf32>
    %222 = arith.addf %221, %35 : vector<8x12xf32>
    %cst_90 = arith.constant dense<0xFF800000> : vector<8xf32>
    %223 = vector.multi_reduction <maximumf>, %222, %cst_90 [1] : vector<8x12xf32> to vector<8xf32>
    %224 = vector.shape_cast %223 : vector<8xf32> to vector<8x1xf32>
    %225 = vector.broadcast %224 : vector<8x1xf32> to vector<8x12xf32>
    %226 = arith.subf %222, %225 : vector<8x12xf32>
    %227 = math.exp %226 : vector<8x12xf32>
    %cst_91 = arith.constant dense<0.000000e+00> : vector<8xf32>
    %228 = vector.multi_reduction <add>, %227, %cst_91 [1] : vector<8x12xf32> to vector<8xf32>
    %229 = vector.shape_cast %228 : vector<8xf32> to vector<8x1xf32>
    %230 = tpu.reciprocal %229 {approx = true} : vector<8x1xf32> -> vector<8x1xf32>
    %231 = vector.broadcast %230 : vector<8x1xf32> to vector<8x12xf32>
    %232 = arith.mulf %227, %231 : vector<8x12xf32>
    %c0_92 = arith.constant 0 : index
    %c2_93 = arith.constant 2 : index
    %233 = vector.load %arg6[%c0_92, %c2_93] : memref<8x6xf32, #tpu.memory_space<vmem>>, vector<8x1xf32>
    %cst_94 = arith.constant dense<0.000000e+00> : vector<8x12xf32>
    %234 = tpu.matmul %232, %28, %cst_94 {dimension_numbers = #tpu.dot_dimension_numbers<[1], [0], [0], [1], [0, 0, 1, 1], [], []>} : vector<8x12xf32>, vector<12x12xf32>, vector<8x12xf32> -> vector<8x12xf32>
    %235 = vector.broadcast %233 : vector<8x1xf32> to vector<8x12xf32>
    %236 = arith.cmpf ogt, %234, %235 : vector<8x12xf32>
    %c12_i32_95 = arith.constant 12 : i32
    %237 = vector.broadcast %c12_i32_95 : i32 to vector<8x12xi32>
    %238 = arith.select %236, %29, %237 : vector<8x12xi1>, vector<8x12xi32>
    %cst_96 = arith.constant dense<2147483647> : vector<8xi32>
    %239 = vector.multi_reduction <minsi>, %238, %cst_96 [1] : vector<8x12xi32> to vector<8xi32>
    %240 = vector.shape_cast %239 : vector<8xi32> to vector<8x1xi32>
    %c12_i32_97 = arith.constant 12 : i32
    %241 = vector.broadcast %c12_i32_97 : i32 to vector<8x1xi32>
    %242 = arith.cmpi eq, %240, %241 : vector<8x1xi32>
    %c7_i32_98 = arith.constant 7 : i32
    %243 = vector.broadcast %c7_i32_98 : i32 to vector<8x1xi32>
    %244 = arith.select %242, %243, %240 : vector<8x1xi1>, vector<8x1xi32>
    %245 = vector.broadcast %244 : vector<8x1xi32> to vector<8x12xi32>
    %246 = arith.cmpi eq, %29, %245 : vector<8x12xi32>
    %247 = arith.extui %246 : vector<8x12xi1> to vector<8x12xi32>
    %248 = arith.sitofp %247 : vector<8x12xi32> to vector<8x12xf32>
    %249 = arith.mulf %248, %232 : vector<8x12xf32>
    %cst_99 = arith.constant dense<0.000000e+00> : vector<8xf32>
    %250 = vector.multi_reduction <add>, %249, %cst_99 [1] : vector<8x12xf32> to vector<8xf32>
    %251 = vector.shape_cast %250 : vector<8xf32> to vector<8x1xf32>
    %c2_i32 = arith.constant 2 : i32
    %252 = vector.broadcast %c2_i32 : i32 to vector<8x6xi32>
    %253 = arith.cmpi eq, %30, %252 : vector<8x6xi32>
    %254 = vector.shape_cast %251 : vector<8x1xf32> to vector<8x1xf32>
    %255 = vector.broadcast %254 : vector<8x1xf32> to vector<8x6xf32>
    %256 = arith.select %253, %255, %184 : vector<8x6xi1>, vector<8x6xf32>
    %257 = vector.shape_cast %244 : vector<8x1xi32> to vector<8x1xi32>
    %258 = vector.broadcast %257 : vector<8x1xi32> to vector<8x6xi32>
    %259 = arith.select %253, %258, %187 : vector<8x6xi1>, vector<8x6xi32>
    %c0_100 = arith.constant 0 : index
    %c0_101 = arith.constant 0 : index
    %260 = vector.load %arg9[%c0_100, %c0_101] : memref<8x36xf32, #tpu.memory_space<vmem>>, vector<8x24xf32>
    tpu.vector_store %arg9[%c0_100, %c0_101], %219 {strides = array<i32>} : memref<8x36xf32, #tpu.memory_space<vmem>>, vector<8x24xf32>,
    %c0_102 = arith.constant 0 : index
    %c24_103 = arith.constant 24 : index
    %261 = vector.load %arg9[%c0_102, %c24_103] : memref<8x36xf32, #tpu.memory_space<vmem>>, vector<8x12xf32>
    tpu.vector_store %arg9[%c0_102, %c24_103], %248 {strides = array<i32>} : memref<8x36xf32, #tpu.memory_space<vmem>>, vector<8x12xf32>,
    %c0_104 = arith.constant 0 : index
    %c0_105 = arith.constant 0 : index
    %262 = vector.load %arg9[%c0_104, %c0_105] : memref<8x36xf32, #tpu.memory_space<vmem>>, vector<8x36xf32>
    %cst_106 = arith.constant dense<0.000000e+00> : vector<8x24xf32>
    %263 = tpu.matmul %262, %1, %cst_106 {dimension_numbers = #tpu.dot_dimension_numbers<[1], [0], [0], [1], [0, 0, 1, 1], [], []>} : vector<8x36xf32>, vector<36x24xf32>, vector<8x24xf32> -> vector<8x24xf32>
    %264 = arith.addf %263, %11 : vector<8x24xf32>
    %265 = arith.negf %264 : vector<8x24xf32>
    %266 = math.exp %265 : vector<8x24xf32>
    %cst_107 = arith.constant 1.000000e+00 : f32
    %267 = vector.broadcast %cst_107 : f32 to vector<8x24xf32>
    %268 = arith.addf %267, %266 : vector<8x24xf32>
    %269 = arith.divf %267, %268 : vector<8x24xf32>
    %cst_108 = arith.constant dense<0.000000e+00> : vector<8x24xf32>
    %270 = tpu.matmul %262, %3, %cst_108 {dimension_numbers = #tpu.dot_dimension_numbers<[1], [0], [0], [1], [0, 0, 1, 1], [], []>} : vector<8x36xf32>, vector<36x24xf32>, vector<8x24xf32> -> vector<8x24xf32>
    %271 = arith.addf %270, %15 : vector<8x24xf32>
    %272 = arith.negf %271 : vector<8x24xf32>
    %273 = math.exp %272 : vector<8x24xf32>
    %cst_109 = arith.constant 1.000000e+00 : f32
    %274 = vector.broadcast %cst_109 : f32 to vector<8x24xf32>
    %275 = arith.addf %274, %273 : vector<8x24xf32>
    %276 = arith.divf %274, %275 : vector<8x24xf32>
    %cst_110 = arith.constant dense<0.000000e+00> : vector<8x24xf32>
    %277 = tpu.matmul %262, %5, %cst_110 {dimension_numbers = #tpu.dot_dimension_numbers<[1], [0], [0], [1], [0, 0, 1, 1], [], []>} : vector<8x36xf32>, vector<36x24xf32>, vector<8x24xf32> -> vector<8x24xf32>
    %278 = arith.addf %277, %19 : vector<8x24xf32>
    %279 = math.tanh %278 : vector<8x24xf32>
    %cst_111 = arith.constant dense<0.000000e+00> : vector<8x24xf32>
    %280 = tpu.matmul %262, %7, %cst_111 {dimension_numbers = #tpu.dot_dimension_numbers<[1], [0], [0], [1], [0, 0, 1, 1], [], []>} : vector<8x36xf32>, vector<36x24xf32>, vector<8x24xf32> -> vector<8x24xf32>
    %281 = arith.addf %280, %23 : vector<8x24xf32>
    %282 = arith.negf %281 : vector<8x24xf32>
    %283 = math.exp %282 : vector<8x24xf32>
    %cst_112 = arith.constant 1.000000e+00 : f32
    %284 = vector.broadcast %cst_112 : f32 to vector<8x24xf32>
    %285 = arith.addf %284, %283 : vector<8x24xf32>
    %286 = arith.divf %284, %285 : vector<8x24xf32>
    %287 = arith.mulf %276, %217 : vector<8x24xf32>
    %288 = arith.mulf %269, %279 : vector<8x24xf32>
    %289 = arith.addf %287, %288 : vector<8x24xf32>
    %290 = math.tanh %289 : vector<8x24xf32>
    %291 = arith.mulf %286, %290 : vector<8x24xf32>
    %cst_113 = arith.constant dense<0.000000e+00> : vector<8x12xf32>
    %292 = tpu.matmul %291, %24, %cst_113 {dimension_numbers = #tpu.dot_dimension_numbers<[1], [0], [0], [1], [0, 0, 1, 1], [], []>} : vector<8x24xf32>, vector<24x12xf32>, vector<8x12xf32> -> vector<8x12xf32>
    %293 = arith.addf %292, %27 : vector<8x12xf32>
    %294 = arith.addf %293, %40 : vector<8x12xf32>
    %cst_114 = arith.constant dense<0xFF800000> : vector<8xf32>
    %295 = vector.multi_reduction <maximumf>, %294, %cst_114 [1] : vector<8x12xf32> to vector<8xf32>
    %296 = vector.shape_cast %295 : vector<8xf32> to vector<8x1xf32>
    %297 = vector.broadcast %296 : vector<8x1xf32> to vector<8x12xf32>
    %298 = arith.subf %294, %297 : vector<8x12xf32>
    %299 = math.exp %298 : vector<8x12xf32>
    %cst_115 = arith.constant dense<0.000000e+00> : vector<8xf32>
    %300 = vector.multi_reduction <add>, %299, %cst_115 [1] : vector<8x12xf32> to vector<8xf32>
    %301 = vector.shape_cast %300 : vector<8xf32> to vector<8x1xf32>
    %302 = tpu.reciprocal %301 {approx = true} : vector<8x1xf32> -> vector<8x1xf32>
    %303 = vector.broadcast %302 : vector<8x1xf32> to vector<8x12xf32>
    %304 = arith.mulf %299, %303 : vector<8x12xf32>
    %c0_116 = arith.constant 0 : index
    %c3_117 = arith.constant 3 : index
    %305 = vector.load %arg6[%c0_116, %c3_117] : memref<8x6xf32, #tpu.memory_space<vmem>>, vector<8x1xf32>
    %cst_118 = arith.constant dense<0.000000e+00> : vector<8x12xf32>
    %306 = tpu.matmul %304, %28, %cst_118 {dimension_numbers = #tpu.dot_dimension_numbers<[1], [0], [0], [1], [0, 0, 1, 1], [], []>} : vector<8x12xf32>, vector<12x12xf32>, vector<8x12xf32> -> vector<8x12xf32>
    %307 = vector.broadcast %305 : vector<8x1xf32> to vector<8x12xf32>
    %308 = arith.cmpf ogt, %306, %307 : vector<8x12xf32>
    %c12_i32_119 = arith.constant 12 : i32
    %309 = vector.broadcast %c12_i32_119 : i32 to vector<8x12xi32>
    %310 = arith.select %308, %29, %309 : vector<8x12xi1>, vector<8x12xi32>
    %cst_120 = arith.constant dense<2147483647> : vector<8xi32>
    %311 = vector.multi_reduction <minsi>, %310, %cst_120 [1] : vector<8x12xi32> to vector<8xi32>
    %312 = vector.shape_cast %311 : vector<8xi32> to vector<8x1xi32>
    %c12_i32_121 = arith.constant 12 : i32
    %313 = vector.broadcast %c12_i32_121 : i32 to vector<8x1xi32>
    %314 = arith.cmpi eq, %312, %313 : vector<8x1xi32>
    %c11_i32_122 = arith.constant 11 : i32
    %315 = vector.broadcast %c11_i32_122 : i32 to vector<8x1xi32>
    %316 = arith.select %314, %315, %312 : vector<8x1xi1>, vector<8x1xi32>
    %317 = vector.broadcast %316 : vector<8x1xi32> to vector<8x12xi32>
    %318 = arith.cmpi eq, %29, %317 : vector<8x12xi32>
    %319 = arith.extui %318 : vector<8x12xi1> to vector<8x12xi32>
    %320 = arith.sitofp %319 : vector<8x12xi32> to vector<8x12xf32>
    %321 = arith.mulf %320, %304 : vector<8x12xf32>
    %cst_123 = arith.constant dense<0.000000e+00> : vector<8xf32>
    %322 = vector.multi_reduction <add>, %321, %cst_123 [1] : vector<8x12xf32> to vector<8xf32>
    %323 = vector.shape_cast %322 : vector<8xf32> to vector<8x1xf32>
    %c3_i32 = arith.constant 3 : i32
    %324 = vector.broadcast %c3_i32 : i32 to vector<8x6xi32>
    %325 = arith.cmpi eq, %30, %324 : vector<8x6xi32>
    %326 = vector.shape_cast %323 : vector<8x1xf32> to vector<8x1xf32>
    %327 = vector.broadcast %326 : vector<8x1xf32> to vector<8x6xf32>
    %328 = arith.select %325, %327, %256 : vector<8x6xi1>, vector<8x6xf32>
    %329 = vector.shape_cast %316 : vector<8x1xi32> to vector<8x1xi32>
    %330 = vector.broadcast %329 : vector<8x1xi32> to vector<8x6xi32>
    %331 = arith.select %325, %330, %259 : vector<8x6xi1>, vector<8x6xi32>
    %c0_124 = arith.constant 0 : index
    %c0_125 = arith.constant 0 : index
    %332 = vector.load %arg9[%c0_124, %c0_125] : memref<8x36xf32, #tpu.memory_space<vmem>>, vector<8x24xf32>
    tpu.vector_store %arg9[%c0_124, %c0_125], %291 {strides = array<i32>} : memref<8x36xf32, #tpu.memory_space<vmem>>, vector<8x24xf32>,
    %c0_126 = arith.constant 0 : index
    %c24_127 = arith.constant 24 : index
    %333 = vector.load %arg9[%c0_126, %c24_127] : memref<8x36xf32, #tpu.memory_space<vmem>>, vector<8x12xf32>
    tpu.vector_store %arg9[%c0_126, %c24_127], %320 {strides = array<i32>} : memref<8x36xf32, #tpu.memory_space<vmem>>, vector<8x12xf32>,
    %c0_128 = arith.constant 0 : index
    %c0_129 = arith.constant 0 : index
    %334 = vector.load %arg9[%c0_128, %c0_129] : memref<8x36xf32, #tpu.memory_space<vmem>>, vector<8x36xf32>
    %cst_130 = arith.constant dense<0.000000e+00> : vector<8x24xf32>
    %335 = tpu.matmul %334, %1, %cst_130 {dimension_numbers = #tpu.dot_dimension_numbers<[1], [0], [0], [1], [0, 0, 1, 1], [], []>} : vector<8x36xf32>, vector<36x24xf32>, vector<8x24xf32> -> vector<8x24xf32>
    %336 = arith.addf %335, %11 : vector<8x24xf32>
    %337 = arith.negf %336 : vector<8x24xf32>
    %338 = math.exp %337 : vector<8x24xf32>
    %cst_131 = arith.constant 1.000000e+00 : f32
    %339 = vector.broadcast %cst_131 : f32 to vector<8x24xf32>
    %340 = arith.addf %339, %338 : vector<8x24xf32>
    %341 = arith.divf %339, %340 : vector<8x24xf32>
    %cst_132 = arith.constant dense<0.000000e+00> : vector<8x24xf32>
    %342 = tpu.matmul %334, %3, %cst_132 {dimension_numbers = #tpu.dot_dimension_numbers<[1], [0], [0], [1], [0, 0, 1, 1], [], []>} : vector<8x36xf32>, vector<36x24xf32>, vector<8x24xf32> -> vector<8x24xf32>
    %343 = arith.addf %342, %15 : vector<8x24xf32>
    %344 = arith.negf %343 : vector<8x24xf32>
    %345 = math.exp %344 : vector<8x24xf32>
    %cst_133 = arith.constant 1.000000e+00 : f32
    %346 = vector.broadcast %cst_133 : f32 to vector<8x24xf32>
    %347 = arith.addf %346, %345 : vector<8x24xf32>
    %348 = arith.divf %346, %347 : vector<8x24xf32>
    %cst_134 = arith.constant dense<0.000000e+00> : vector<8x24xf32>
    %349 = tpu.matmul %334, %5, %cst_134 {dimension_numbers = #tpu.dot_dimension_numbers<[1], [0], [0], [1], [0, 0, 1, 1], [], []>} : vector<8x36xf32>, vector<36x24xf32>, vector<8x24xf32> -> vector<8x24xf32>
    %350 = arith.addf %349, %19 : vector<8x24xf32>
    %351 = math.tanh %350 : vector<8x24xf32>
    %cst_135 = arith.constant dense<0.000000e+00> : vector<8x24xf32>
    %352 = tpu.matmul %334, %7, %cst_135 {dimension_numbers = #tpu.dot_dimension_numbers<[1], [0], [0], [1], [0, 0, 1, 1], [], []>} : vector<8x36xf32>, vector<36x24xf32>, vector<8x24xf32> -> vector<8x24xf32>
    %353 = arith.addf %352, %23 : vector<8x24xf32>
    %354 = arith.negf %353 : vector<8x24xf32>
    %355 = math.exp %354 : vector<8x24xf32>
    %cst_136 = arith.constant 1.000000e+00 : f32
    %356 = vector.broadcast %cst_136 : f32 to vector<8x24xf32>
    %357 = arith.addf %356, %355 : vector<8x24xf32>
    %358 = arith.divf %356, %357 : vector<8x24xf32>
    %359 = arith.mulf %348, %289 : vector<8x24xf32>
    %360 = arith.mulf %341, %351 : vector<8x24xf32>
    %361 = arith.addf %359, %360 : vector<8x24xf32>
    %362 = math.tanh %361 : vector<8x24xf32>
    %363 = arith.mulf %358, %362 : vector<8x24xf32>
    %cst_137 = arith.constant dense<0.000000e+00> : vector<8x12xf32>
    %364 = tpu.matmul %363, %24, %cst_137 {dimension_numbers = #tpu.dot_dimension_numbers<[1], [0], [0], [1], [0, 0, 1, 1], [], []>} : vector<8x24xf32>, vector<24x12xf32>, vector<8x12xf32> -> vector<8x12xf32>
    %365 = arith.addf %364, %27 : vector<8x12xf32>
    %366 = arith.addf %365, %35 : vector<8x12xf32>
    %cst_138 = arith.constant dense<0xFF800000> : vector<8xf32>
    %367 = vector.multi_reduction <maximumf>, %366, %cst_138 [1] : vector<8x12xf32> to vector<8xf32>
    %368 = vector.shape_cast %367 : vector<8xf32> to vector<8x1xf32>
    %369 = vector.broadcast %368 : vector<8x1xf32> to vector<8x12xf32>
    %370 = arith.subf %366, %369 : vector<8x12xf32>
    %371 = math.exp %370 : vector<8x12xf32>
    %cst_139 = arith.constant dense<0.000000e+00> : vector<8xf32>
    %372 = vector.multi_reduction <add>, %371, %cst_139 [1] : vector<8x12xf32> to vector<8xf32>
    %373 = vector.shape_cast %372 : vector<8xf32> to vector<8x1xf32>
    %374 = tpu.reciprocal %373 {approx = true} : vector<8x1xf32> -> vector<8x1xf32>
    %375 = vector.broadcast %374 : vector<8x1xf32> to vector<8x12xf32>
    %376 = arith.mulf %371, %375 : vector<8x12xf32>
    %c0_140 = arith.constant 0 : index
    %c4 = arith.constant 4 : index
    %377 = vector.load %arg6[%c0_140, %c4] : memref<8x6xf32, #tpu.memory_space<vmem>>, vector<8x1xf32>
    %cst_141 = arith.constant dense<0.000000e+00> : vector<8x12xf32>
    %378 = tpu.matmul %376, %28, %cst_141 {dimension_numbers = #tpu.dot_dimension_numbers<[1], [0], [0], [1], [0, 0, 1, 1], [], []>} : vector<8x12xf32>, vector<12x12xf32>, vector<8x12xf32> -> vector<8x12xf32>
    %379 = vector.broadcast %377 : vector<8x1xf32> to vector<8x12xf32>
    %380 = arith.cmpf ogt, %378, %379 : vector<8x12xf32>
    %c12_i32_142 = arith.constant 12 : i32
    %381 = vector.broadcast %c12_i32_142 : i32 to vector<8x12xi32>
    %382 = arith.select %380, %29, %381 : vector<8x12xi1>, vector<8x12xi32>
    %cst_143 = arith.constant dense<2147483647> : vector<8xi32>
    %383 = vector.multi_reduction <minsi>, %382, %cst_143 [1] : vector<8x12xi32> to vector<8xi32>
    %384 = vector.shape_cast %383 : vector<8xi32> to vector<8x1xi32>
    %c12_i32_144 = arith.constant 12 : i32
    %385 = vector.broadcast %c12_i32_144 : i32 to vector<8x1xi32>
    %386 = arith.cmpi eq, %384, %385 : vector<8x1xi32>
    %c7_i32_145 = arith.constant 7 : i32
    %387 = vector.broadcast %c7_i32_145 : i32 to vector<8x1xi32>
    %388 = arith.select %386, %387, %384 : vector<8x1xi1>, vector<8x1xi32>
    %389 = vector.broadcast %388 : vector<8x1xi32> to vector<8x12xi32>
    %390 = arith.cmpi eq, %29, %389 : vector<8x12xi32>
    %391 = arith.extui %390 : vector<8x12xi1> to vector<8x12xi32>
    %392 = arith.sitofp %391 : vector<8x12xi32> to vector<8x12xf32>
    %393 = arith.mulf %392, %376 : vector<8x12xf32>
    %cst_146 = arith.constant dense<0.000000e+00> : vector<8xf32>
    %394 = vector.multi_reduction <add>, %393, %cst_146 [1] : vector<8x12xf32> to vector<8xf32>
    %395 = vector.shape_cast %394 : vector<8xf32> to vector<8x1xf32>
    %c4_i32 = arith.constant 4 : i32
    %396 = vector.broadcast %c4_i32 : i32 to vector<8x6xi32>
    %397 = arith.cmpi eq, %30, %396 : vector<8x6xi32>
    %398 = vector.shape_cast %395 : vector<8x1xf32> to vector<8x1xf32>
    %399 = vector.broadcast %398 : vector<8x1xf32> to vector<8x6xf32>
    %400 = arith.select %397, %399, %328 : vector<8x6xi1>, vector<8x6xf32>
    %401 = vector.shape_cast %388 : vector<8x1xi32> to vector<8x1xi32>
    %402 = vector.broadcast %401 : vector<8x1xi32> to vector<8x6xi32>
    %403 = arith.select %397, %402, %331 : vector<8x6xi1>, vector<8x6xi32>
    %c0_147 = arith.constant 0 : index
    %c0_148 = arith.constant 0 : index
    %404 = vector.load %arg9[%c0_147, %c0_148] : memref<8x36xf32, #tpu.memory_space<vmem>>, vector<8x24xf32>
    tpu.vector_store %arg9[%c0_147, %c0_148], %363 {strides = array<i32>} : memref<8x36xf32, #tpu.memory_space<vmem>>, vector<8x24xf32>,
    %c0_149 = arith.constant 0 : index
    %c24_150 = arith.constant 24 : index
    %405 = vector.load %arg9[%c0_149, %c24_150] : memref<8x36xf32, #tpu.memory_space<vmem>>, vector<8x12xf32>
    tpu.vector_store %arg9[%c0_149, %c24_150], %392 {strides = array<i32>} : memref<8x36xf32, #tpu.memory_space<vmem>>, vector<8x12xf32>,
    %c0_151 = arith.constant 0 : index
    %c0_152 = arith.constant 0 : index
    %406 = vector.load %arg9[%c0_151, %c0_152] : memref<8x36xf32, #tpu.memory_space<vmem>>, vector<8x36xf32>
    %cst_153 = arith.constant dense<0.000000e+00> : vector<8x24xf32>
    %407 = tpu.matmul %406, %1, %cst_153 {dimension_numbers = #tpu.dot_dimension_numbers<[1], [0], [0], [1], [0, 0, 1, 1], [], []>} : vector<8x36xf32>, vector<36x24xf32>, vector<8x24xf32> -> vector<8x24xf32>
    %408 = arith.addf %407, %11 : vector<8x24xf32>
    %409 = arith.negf %408 : vector<8x24xf32>
    %410 = math.exp %409 : vector<8x24xf32>
    %cst_154 = arith.constant 1.000000e+00 : f32
    %411 = vector.broadcast %cst_154 : f32 to vector<8x24xf32>
    %412 = arith.addf %411, %410 : vector<8x24xf32>
    %413 = arith.divf %411, %412 : vector<8x24xf32>
    %cst_155 = arith.constant dense<0.000000e+00> : vector<8x24xf32>
    %414 = tpu.matmul %406, %3, %cst_155 {dimension_numbers = #tpu.dot_dimension_numbers<[1], [0], [0], [1], [0, 0, 1, 1], [], []>} : vector<8x36xf32>, vector<36x24xf32>, vector<8x24xf32> -> vector<8x24xf32>
    %415 = arith.addf %414, %15 : vector<8x24xf32>
    %416 = arith.negf %415 : vector<8x24xf32>
    %417 = math.exp %416 : vector<8x24xf32>
    %cst_156 = arith.constant 1.000000e+00 : f32
    %418 = vector.broadcast %cst_156 : f32 to vector<8x24xf32>
    %419 = arith.addf %418, %417 : vector<8x24xf32>
    %420 = arith.divf %418, %419 : vector<8x24xf32>
    %cst_157 = arith.constant dense<0.000000e+00> : vector<8x24xf32>
    %421 = tpu.matmul %406, %5, %cst_157 {dimension_numbers = #tpu.dot_dimension_numbers<[1], [0], [0], [1], [0, 0, 1, 1], [], []>} : vector<8x36xf32>, vector<36x24xf32>, vector<8x24xf32> -> vector<8x24xf32>
    %422 = arith.addf %421, %19 : vector<8x24xf32>
    %423 = math.tanh %422 : vector<8x24xf32>
    %cst_158 = arith.constant dense<0.000000e+00> : vector<8x24xf32>
    %424 = tpu.matmul %406, %7, %cst_158 {dimension_numbers = #tpu.dot_dimension_numbers<[1], [0], [0], [1], [0, 0, 1, 1], [], []>} : vector<8x36xf32>, vector<36x24xf32>, vector<8x24xf32> -> vector<8x24xf32>
    %425 = arith.addf %424, %23 : vector<8x24xf32>
    %426 = arith.negf %425 : vector<8x24xf32>
    %427 = math.exp %426 : vector<8x24xf32>
    %cst_159 = arith.constant 1.000000e+00 : f32
    %428 = vector.broadcast %cst_159 : f32 to vector<8x24xf32>
    %429 = arith.addf %428, %427 : vector<8x24xf32>
    %430 = arith.divf %428, %429 : vector<8x24xf32>
    %431 = arith.mulf %420, %361 : vector<8x24xf32>
    %432 = arith.mulf %413, %423 : vector<8x24xf32>
    %433 = arith.addf %431, %432 : vector<8x24xf32>
    %434 = math.tanh %433 : vector<8x24xf32>
    %435 = arith.mulf %430, %434 : vector<8x24xf32>
    %cst_160 = arith.constant dense<0.000000e+00> : vector<8x12xf32>
    %436 = tpu.matmul %435, %24, %cst_160 {dimension_numbers = #tpu.dot_dimension_numbers<[1], [0], [0], [1], [0, 0, 1, 1], [], []>} : vector<8x24xf32>, vector<24x12xf32>, vector<8x12xf32> -> vector<8x12xf32>
    %437 = arith.addf %436, %27 : vector<8x12xf32>
    %438 = arith.addf %437, %40 : vector<8x12xf32>
    %cst_161 = arith.constant dense<0xFF800000> : vector<8xf32>
    %439 = vector.multi_reduction <maximumf>, %438, %cst_161 [1] : vector<8x12xf32> to vector<8xf32>
    %440 = vector.shape_cast %439 : vector<8xf32> to vector<8x1xf32>
    %441 = vector.broadcast %440 : vector<8x1xf32> to vector<8x12xf32>
    %442 = arith.subf %438, %441 : vector<8x12xf32>
    %443 = math.exp %442 : vector<8x12xf32>
    %cst_162 = arith.constant dense<0.000000e+00> : vector<8xf32>
    %444 = vector.multi_reduction <add>, %443, %cst_162 [1] : vector<8x12xf32> to vector<8xf32>
    %445 = vector.shape_cast %444 : vector<8xf32> to vector<8x1xf32>
    %446 = tpu.reciprocal %445 {approx = true} : vector<8x1xf32> -> vector<8x1xf32>
    %447 = vector.broadcast %446 : vector<8x1xf32> to vector<8x12xf32>
    %448 = arith.mulf %443, %447 : vector<8x12xf32>
    %c0_163 = arith.constant 0 : index
    %c5 = arith.constant 5 : index
    %449 = vector.load %arg6[%c0_163, %c5] : memref<8x6xf32, #tpu.memory_space<vmem>>, vector<8x1xf32>
    %cst_164 = arith.constant dense<0.000000e+00> : vector<8x12xf32>
    %450 = tpu.matmul %448, %28, %cst_164 {dimension_numbers = #tpu.dot_dimension_numbers<[1], [0], [0], [1], [0, 0, 1, 1], [], []>} : vector<8x12xf32>, vector<12x12xf32>, vector<8x12xf32> -> vector<8x12xf32>
    %451 = vector.broadcast %449 : vector<8x1xf32> to vector<8x12xf32>
    %452 = arith.cmpf ogt, %450, %451 : vector<8x12xf32>
    %c12_i32_165 = arith.constant 12 : i32
    %453 = vector.broadcast %c12_i32_165 : i32 to vector<8x12xi32>
    %454 = arith.select %452, %29, %453 : vector<8x12xi1>, vector<8x12xi32>
    %cst_166 = arith.constant dense<2147483647> : vector<8xi32>
    %455 = vector.multi_reduction <minsi>, %454, %cst_166 [1] : vector<8x12xi32> to vector<8xi32>
    %456 = vector.shape_cast %455 : vector<8xi32> to vector<8x1xi32>
    %c12_i32_167 = arith.constant 12 : i32
    %457 = vector.broadcast %c12_i32_167 : i32 to vector<8x1xi32>
    %458 = arith.cmpi eq, %456, %457 : vector<8x1xi32>
    %c11_i32_168 = arith.constant 11 : i32
    %459 = vector.broadcast %c11_i32_168 : i32 to vector<8x1xi32>
    %460 = arith.select %458, %459, %456 : vector<8x1xi1>, vector<8x1xi32>
    %461 = vector.broadcast %460 : vector<8x1xi32> to vector<8x12xi32>
    %462 = arith.cmpi eq, %29, %461 : vector<8x12xi32>
    %463 = arith.extui %462 : vector<8x12xi1> to vector<8x12xi32>
    %464 = arith.sitofp %463 : vector<8x12xi32> to vector<8x12xf32>
    %465 = arith.mulf %464, %448 : vector<8x12xf32>
    %cst_169 = arith.constant dense<0.000000e+00> : vector<8xf32>
    %466 = vector.multi_reduction <add>, %465, %cst_169 [1] : vector<8x12xf32> to vector<8xf32>
    %467 = vector.shape_cast %466 : vector<8xf32> to vector<8x1xf32>
    %c5_i32 = arith.constant 5 : i32
    %468 = vector.broadcast %c5_i32 : i32 to vector<8x6xi32>
    %469 = arith.cmpi eq, %30, %468 : vector<8x6xi32>
    %470 = vector.shape_cast %467 : vector<8x1xf32> to vector<8x1xf32>
    %471 = vector.broadcast %470 : vector<8x1xf32> to vector<8x6xf32>
    %472 = arith.select %469, %471, %400 : vector<8x6xi1>, vector<8x6xf32>
    %473 = vector.shape_cast %460 : vector<8x1xi32> to vector<8x1xi32>
    %474 = vector.broadcast %473 : vector<8x1xi32> to vector<8x6xi32>
    %475 = arith.select %469, %474, %403 : vector<8x6xi1>, vector<8x6xi32>
    %c0_170 = arith.constant 0 : index
    %c0_171 = arith.constant 0 : index
    %476 = vector.load %arg9[%c0_170, %c0_171] : memref<8x36xf32, #tpu.memory_space<vmem>>, vector<8x24xf32>
    tpu.vector_store %arg9[%c0_170, %c0_171], %435 {strides = array<i32>} : memref<8x36xf32, #tpu.memory_space<vmem>>, vector<8x24xf32>,
    %c0_172 = arith.constant 0 : index
    %c24_173 = arith.constant 24 : index
    %477 = vector.load %arg9[%c0_172, %c24_173] : memref<8x36xf32, #tpu.memory_space<vmem>>, vector<8x12xf32>
    tpu.vector_store %arg9[%c0_172, %c24_173], %464 {strides = array<i32>} : memref<8x36xf32, #tpu.memory_space<vmem>>, vector<8x12xf32>,
    %c0_174 = arith.constant 0 : index
    %c0_175 = arith.constant 0 : index
    %478 = vector.load %arg7[%c0_174, %c0_175] : memref<8x6xf32, #tpu.memory_space<vmem>>, vector<8x6xf32>
    tpu.vector_store %arg7[%c0_174, %c0_175], %472 {strides = array<i32>} : memref<8x6xf32, #tpu.memory_space<vmem>>, vector<8x6xf32>,
    %c0_176 = arith.constant 0 : index
    %c0_177 = arith.constant 0 : index
    %479 = vector.load %arg8[%c0_176, %c0_177] : memref<8x6xi32, #tpu.memory_space<vmem>>, vector<8x6xi32>
    tpu.vector_store %arg8[%c0_176, %c0_177], %475 {strides = array<i32>} : memref<8x6xi32, #tpu.memory_space<vmem>>, vector<8x6xi32>,
    return
  }
  func.func @transform_0(%arg0: i32) -> (i32, i32, i32) {
    %c0_i32 = arith.constant 0 : i32
    %c0_i32_0 = arith.constant 0 : i32
    %c0_i32_1 = arith.constant 0 : i32
    %c0_i32_2 = arith.constant 0 : i32
    return %c0_i32, %c0_i32_0, %c0_i32_1 : i32, i32, i32
  }
  func.func @transform_1(%arg0: i32) -> (i32, i32, i32) {
    %c0_i32 = arith.constant 0 : i32
    %c0_i32_0 = arith.constant 0 : i32
    %c0_i32_1 = arith.constant 0 : i32
    %c0_i32_2 = arith.constant 0 : i32
    return %c0_i32, %c0_i32_0, %c0_i32_1 : i32, i32, i32
  }
  func.func @transform_2(%arg0: i32) -> (i32, i32) {
    %c0_i32 = arith.constant 0 : i32
    %c0_i32_0 = arith.constant 0 : i32
    %c0_i32_1 = arith.constant 0 : i32
    return %c0_i32, %c0_i32_0 : i32, i32
  }
  func.func @transform_3(%arg0: i32) -> (i32, i32) {
    %c0_i32 = arith.constant 0 : i32
    %c0_i32_0 = arith.constant 0 : i32
    %c0_i32_1 = arith.constant 0 : i32
    return %c0_i32, %c0_i32_0 : i32, i32
  }
  func.func @transform_4(%arg0: i32) -> (i32, i32) {
    %c0_i32 = arith.constant 0 : i32
    %c0_i32_0 = arith.constant 0 : i32
    %c0_i32_1 = arith.constant 0 : i32
    return %c0_i32, %c0_i32_0 : i32, i32
  }
  func.func @transform_5(%arg0: i32) -> (i32, i32) {
    %c0_i32 = arith.constant 0 : i32
    %c0_i32_0 = arith.constant 0 : i32
    return %arg0, %c0_i32 : i32, i32
  }
  func.func @transform_6(%arg0: i32) -> (i32, i32) {
    %c0_i32 = arith.constant 0 : i32
    %c0_i32_0 = arith.constant 0 : i32
    return %arg0, %c0_i32 : i32, i32
  }
  func.func @transform_7(%arg0: i32) -> (i32, i32) {
    %c0_i32 = arith.constant 0 : i32
    %c0_i32_0 = arith.constant 0 : i32
    return %arg0, %c0_i32 : i32, i32
  }
}

</mosaic_0001>

<bundles_post_ra>
// kernel: tpu_custom_call.1
= control target key start
LH: loop header
LB: loop body
LE: loop exit
PB: predicated region body
PF: predicated region fallthrough
CT: control target
= control target key end

     0   :  { %s4457_s24 = smov 0   ;;  %s5454_s0 = inlined_call_operand.vmem [shape: f32[4,36,24], index: 0, kind: input, shape index: {}]   ;;  %s5455_s1 = inlined_call_operand.vmem [shape: f32[4,1,24], index: 1, kind: input, shape index: {}]   ;;  %s5456_s2 = inlined_call_operand.vmem [shape: f32[24,12], index: 2, kind: input, shape index: {}]   ;;  %s5457_s3 = inlined_call_operand.vmem [shape: f32[1,12], index: 3, kind: input, shape index: {}]   ;;  %s5458_s4 = inlined_call_operand.vmem [shape: f32[12,12], index: 4, kind: input, shape index: {}]   ;;  %s5459_s5 = inlined_call_operand.vmem [shape: f32[16,6], index: 5, kind: input, shape index: {}]   ;;  %s5460_s6 = inlined_call_operand.vmem [shape: f32[16,6], index: 6, kind: output, shape index: {0}]   ;;  %s5461_s7 = inlined_call_operand.vmem [shape: s32[16,6], index: 7, kind: output, shape index: {1}]  }
   0x1 LB: > { %s3507_s25 = sadd.s32 4294967295, %s4405_s24   ;;  %p3511_p0 = scmp.ge.s32.totalorder %s4405_s24, 1  ;;  %s4405_s24 = sphi %s4457_s24, %s18_s24  }
   0x2   : > { %p239_p1 = scmp.lt.s32.totalorder %s4405_s24, 3 }
   0x4   : > { %p240_p2 = pnand %p3511_p0, %p239_p1 }
   0x5   : > { %p273_p3 = scmp.lt.s32.totalorder (!%p240_p2), %s3507_s25, 1 }
   0x6   : > { %243 = sbr.rel (%p240_p2) target bundleno = 8242 (0x2032), region = 44 }
   0xb   : > { %v4468_v0 = vld [vmem:[%s5454_s0 + $0x20] sm:$0xf]  ;;  %vm363_vm0 = vcmask 1043456   ;;  %v4473_v1 = vld [vmem:[%s5454_s0 + $0x48] sm:$0xf]  ;;  %v4407_v2 = vmov 0.0   ;;  %v351_v59 = vlaneseq }
   0xc   : > { %3816 = vmatprep.subr.mxu0 %v4407_v2  ;;  %3829 = vmatprep.subr.mxu1 %v4407_v2  ;;  %v4480_v3 = vld [vmem:[%s5454_s0 + $0x18] sm:$0xff]  ;;  %v4485_v4 = vld [vmem:[%s5454_s0 + $0x40] sm:$0xff]  ;;  %vm357_vm1 = vcmask 293888   ;;  %v4498_v5 = vld [vmem:[%s5454_s0 + $0x10] sm:$0xff]  ;;  %vm4408_vm2 = vmmov 0   ;;  %vm680_vm3 = vcmask 195584  }
   0xd   : > { %3817 = vmatpush3.msk.msra.mxu0 %vm363_vm0, %v4468_v0  ;;  %3830 = vmatpush3.msk.msra.mxu1 %vm363_vm0, %v4473_v1  ;;  %358 = vst.msk [vmem:[#allocation2] sm:$0xff] %vm357_vm1, %v4407_v2  ;;  %v4503_v6 = vld [vmem:[%s5454_s0 + $0x38] sm:$0xff]  ;;  %v4512_v7 = vld [vmem:[%s5454_s0 + $0x8] sm:$0xff]  ;;  %v4517_v8 = vld [vmem:[%s5454_s0 + $0x30] sm:$0xff]  ;;  %v4692_v60 = vand.u32 127, %v351_v59  ;;  %vm755_vm5 = vcmask 97280  }
   0xe   : > { %3818 = vmatprep.subr.mxu0 %v4407_v2  ;;  %3831 = vmatprep.subr.mxu1 %v4407_v2  ;;  %v4526_v9 = vld [vmem:[%s5454_s0] sm:$0xff]  ;;  %v4533_v10 = vld [vmem:[%s5454_s0 + $0x28] sm:$0xff]  ;;  %v4546_v12 = vld [vmem:[%s5454_s0 + $0x70] sm:$0xf]  ;;  %v4409_v63 = vmov -1e+30  }
   0xf   : > { %3819 = vmatpush3.msra.mxu0 %v4480_v3  ;;  %3832 = vmatpush3.msra.mxu1 %v4485_v4  ;;  %v4551_v13 = vld [vmem:[%s5454_s0 + $0x98] sm:$0xf]  ;;  %v4560_v14 = vld [vmem:[%s5454_s0 + $0x68] sm:$0xff]  ;;  %v4565_v15 = vld [vmem:[%s5454_s0 + $0x90] sm:$0xff]  ;;  %vm353_vm4 = vcmp.lt.s32.totalorder %v4692_v60, 8  ;;  %s5463_s25 = smov (!%p273_p3, %s3507_s25), 1 }
  0x10   : > { %3820 = vmatprep.subr.mxu0 %v4407_v2  ;;  %3833 = vmatprep.subr.mxu1 %v4407_v2  ;;  %v4576_v16 = vld [vmem:[%s5454_s0 + $0x60] sm:$0xff]  ;;  %v4581_v17 = vld [vmem:[%s5454_s0 + $0x88] sm:$0xff]  ;;  %v4590_v18 = vld [vmem:[%s5454_s0 + $0x58] sm:$0xff]  ;;  %s4726_s21 = sshll.u32 %s5463_s25, 3  ;;  %s4411_s25 = smov 24   ;;  %vm883_vm10 = vcmask 294080  }
  0x11   : > { %3821 = vmatpush3.msra.mxu0 %v4498_v5  ;;  %3834 = vmatpush3.msra.mxu1 %v4503_v6  ;;  %v4595_v19 = vld [vmem:[%s5454_s0 + $0x80] sm:$0xff]  ;;  %v4604_v20 = vld [vmem:[%s5454_s0 + $0x50] sm:$0xff]  ;;  %v4611_v21 = vld [vmem:[%s5454_s0 + $0x78] sm:$0xff]  ;;  %s4732_s26 = scalar_lea.vmem %s5459_s5, %s4726_s21  ;;  %vm355_vm11 = vcmp.ge.s32.totalorder %v4692_v60, 8  ;;  %vm875_vm14 = vcmp.eq.s32.totalorder %v4692_v60, 0  ;;  %vm1383_vm15 = vcmp.eq.s32.totalorder %v4692_v60, 1  ;;  %s284_s8 = scalar_lea.vmem %s5461_s7, %s4726_s21 }
  0x12   : > { %3822 = vmatprep.subr.mxu0 %v4407_v2  ;;  %3835 = vmatprep.subr.mxu1 %v4407_v2  ;;  %v4632_v22 = vld [vmem:[%s5456_s2 + $0x10] sm:$0xff]  ;;  %v4637_v23 = vld [vmem:[%s5456_s2 + $0x8] sm:$0xff]  ;;  %v4644_v24 = vld [vmem:[%s5456_s2] sm:$0xff] }
  0x13   : > { %3823 = vmatpush3.msra.mxu0 %v4512_v7  ;;  %3836 = vmatpush3.msra.mxu1 %v4517_v8  ;;  %v4653_v25 = vld [vmem:[%s5455_s1] ss:$0 sm:$0xff]  ;;  %v4658_v26 = vld [vmem:[%s5455_s1 + $0x1] ss:$0 sm:$0xff]  ;;  %v4665_v35 = vld [vmem:[%s5455_s1 + $0x3] ss:$0 sm:$0xff] }
  0x14   : > { %3824 = vmatprep.subr.mxu0 %v4407_v2  ;;  %3837 = vmatprep.subr.mxu1 %v4407_v2  ;;  %v359_v11 = vld [vmem:[#allocation2] sm:$0xff] }
  0x15   : > { %3825 = vmatpush3.msra.mxu0 %v4526_v9  ;;  %3826 = vmatprep.mubr.msk.f32.mxu0 %vm4408_vm2, %v4407_v2  ;;  %v4670_v36 = vld [vmem:[%s5455_s1 + $0x2] ss:$0 sm:$0xff]  ;;  %v4698_v61 = vld [vmem:[%s5457_s3] ss:$0 sm:$0xff] }
  0x16   : > { %3838 = vmatpush3.msra.mxu1 %v4533_v10  ;;  %3839 = vmatprep.mubr.msk.f32.mxu1 %vm4408_vm2, %v4407_v2 }
  0x17   : > { %3827 = vmatmul.mubr.msk.f32.vlgmr.msra.gmra.mxu0 %vm357_vm1, %v359_v11  ;;  %3840 = vmatmul.mubr.msk.f32.vlgmr.msra.gmra.mxu1 %vm357_vm1, %v359_v11 }
  0x18   : > { %3842 = vmatprep.subr.mxu0 %v4407_v2  ;;  %3855 = vmatprep.subr.mxu1 %v4407_v2 }
  0x19   : > { %3843 = vmatpush3.msk.msra.mxu0 %vm363_vm0, %v4546_v12  ;;  %3856 = vmatpush3.msk.msra.mxu1 %vm363_vm0, %v4551_v13 }
  0x1a   : > { %3844 = vmatprep.subr.mxu0 %v4407_v2  ;;  %3857 = vmatprep.subr.mxu1 %v4407_v2 }
  0x1b   : > { %3845 = vmatpush3.msra.mxu0 %v4560_v14  ;;  %3858 = vmatpush3.msra.mxu1 %v4565_v15 }
  0x1c   : > { %3846 = vmatprep.subr.mxu0 %v4407_v2  ;;  %3859 = vmatprep.subr.mxu1 %v4407_v2 }
  0x1d   : > { %3847 = vmatpush3.msra.mxu0 %v4576_v16  ;;  %3860 = vmatpush3.msra.mxu1 %v4581_v17 }
  0x1e   : > { %3848 = vmatprep.subr.mxu0 %v4407_v2  ;;  %3861 = vmatprep.subr.mxu1 %v4407_v2 }
  0x1f   : > { %3849 = vmatpush3.msra.mxu0 %v4590_v18  ;;  %3862 = vmatpush3.msra.mxu1 %v4595_v19 }
  0x20   : > { %3850 = vmatprep.subr.mxu0 %v4407_v2  ;;  %3863 = vmatprep.subr.mxu1 %v4407_v2 }
  0x21   : > { %3851 = vmatpush3.msra.mxu0 %v4604_v20  ;;  %3852 = vmatprep.mubr.msk.f32.mxu0 %vm4408_vm2, %v4407_v2 }
  0x22   : > { %3864 = vmatpush3.msra.mxu1 %v4611_v21  ;;  %3865 = vmatprep.mubr.msk.f32.mxu1 %vm4408_vm2, %v4407_v2 }
  0x23   : > { %3853 = vmatmul.mubr.msk.f32.vlgmr.msra.gmra.mxu0 %vm357_vm1, %v359_v11  ;;  %3866 = vmatmul.mubr.msk.f32.vlgmr.msra.gmra.mxu1 %vm357_vm1, %v359_v11  ;;  %v4701_v11 = vsel %vm353_vm4, 0.0, %v4409_v63 }
  0x24   : > { %3868 = vmatprep.subr.mxu0 %v4407_v2  ;;  %3874 = vmatprep.mubr.msk.f32.mxu0 %vm4408_vm2, %v4407_v2 }
  0x25   : > { %3877 = vmatprep.subr.mxu1 %v4407_v2  ;;  %3881 = vmatprep.mubr.msk.f32.mxu1 %vm4408_vm2, %v4407_v2 }
  0x26   : > { %3869 = vmatpush3.msra.mxu0 %v4632_v22 }
  0x27   : > { %3870 = vmatprep.subr.mxu0 %v4407_v2 }
  0x28   : > { %3871 = vmatpush3.msra.mxu0 %v4637_v23 }
  0x29   : > { %3872 = vmatprep.subr.mxu0 %v4407_v2 }
  0x2a   : > { %3873 = vmatpush3.msra.mxu0 %v4644_v24 }
  0x2b   : > { %3897 = vmatprep.subr.mxu0 %v4407_v2 }
  0xd7   : > { %v433_v27 = vpop.f32.mrf.mxu0  ;;  %v512_v28 = vpop.f32.mrf.mxu1 }
  0xd8   : > { %v434_v29 = vadd.f32 %v4653_v25, %v433_v27  ;;  %v513_v30 = vadd.f32 %v4658_v26, %v512_v28 }
  0xd9   : > { %v3828_v31 = vpop.f32.mrf.mxu0  ;;  %v3841_v32 = vpop.f32.mrf.mxu1 }
  0xda   : > { %v3540_v33 = vmul.f32 -1.442695, %v434_v29  ;;  %v3543_v34 = vmul.f32 -1.442695, %v513_v30 }
  0xdc   : > { %4249 = vpow2.f32 %v3540_v33 }
  0xdd   : > { %4251 = vpow2.f32 %v3543_v34 }
  0xe3   : > { %v591_v37 = vpop.f32.mrf.mxu0  ;;  %v665_v38 = vpop.f32.mrf.mxu1 }
  0xe4   : > { %v666_v39 = vadd.f32 %v4665_v35, %v665_v38  ;;  %v592_v42 = vadd.f32 %v4670_v36, %v591_v37  ;;  %v4710_v38 = vld [vmem:[%s5458_s4 + $0x8] sm:$0xf] }
  0xe5   : > { %v3854_v40 = vpop.f32.mrf.mxu0  ;;  %v3867_v41 = vpop.f32.mrf.mxu1  ;;  %3878 = vmatpush3.msk.msra.mxu1 %vm363_vm0, %v4710_v38 }
  0xe6   : > { %v3548_v43 = vmul.f32 -1.442695, %v666_v39  ;;  %v4715_v39 = vld [vmem:[%s5458_s4] sm:$0xff]  ;;  %3879 = vmatprep.subr.mxu1 %v4407_v2  ;;  %v4410_v40 = vmov 0  }
  0xe7   : > { %3880 = vmatpush3.msra.mxu1 %v4715_v39  ;;  %4242 = vset.pattern.permute.xlu1 %v4410_v40  ;;  %v4735_v41 = vld [vmem:[%s4732_s26] sm:$0xff] }
  0xe8   : > { %4253 = vpow2.f32 %v3548_v43  ;;  %3884 = vmatprep.subr.mxu1 %v4407_v2  ;;  %846 = vperm.xlu1 %4242, %v4735_v41  }
  0xe9   : > { %v4250_v44 = vpop.eup %4249  ;;  %4255 = vtanh.f32 %v592_v42 }
  0xea   : > { %v4252_v45 = vpop.eup %4251  ;;  %v440_v46 = vadd.f32 1.0, %v4250_v44 }
  0xeb   : > { %v519_v47 = vadd.f32 1.0, %v4252_v45 }
  0xec   : > { %4257 = vrcp.f32 %v440_v46 }
  0xed   : > { %4259 = vrcp.f32 %v519_v47 }
  0xf5   : > { %v4254_v48 = vpop.eup %4253 }
  0xf6   : > { %v4256_v49 = vpop.eup %4255  ;;  %v672_v51 = vadd.f32 1.0, %v4254_v48 }
  0xf8   : > { %4261 = vrcp.f32 %v672_v51 }
  0xf9   : > { %v4258_v50 = vpop.eup %4257 }
  0xfa   : > { %v4260_v52 = vpop.eup %4259  ;;  %v676_v53 = vmul.f32 %v4258_v50, %v4256_v49 }
  0xfb   : > { %v675_v54 = vmul.f32 0.0, %v4260_v52 }
  0xfd   : > { %v4674_v55 = vadd.f32 %v676_v53, %v675_v54 }
  0xff   : > { %4263 = vtanh.f32 %v4674_v55 }
 0x105   : > { %v4262_v56 = vpop.eup %4261 }
 0x10c   : > { %v4264_v57 = vpop.eup %4263 }
 0x10d   : > { %v679_v58 = vmul.f32 %v4264_v57, %v4262_v56 }
 0x10f   : > { %3875 = vmatmul.mubr.msk.f32.vlgmr.msra.gmra.mxu0 %vm680_vm3, %v679_v58  ;;  %878 = vst.msk [vmem:[#allocation2] sm:$0xff] %vm680_vm3, %v679_v58 }
 0x110   : > { %3898 = vmatpush3.msk.msra.mxu0 %vm363_vm0, %v4473_v1  ;;  %3907 = vmatprep.mubr.msk.f32.mxu0 %vm4408_vm2, %v4407_v2 }
 0x111   : > { %3899 = vmatprep.subr.mxu0 %v4407_v2 }
 0x112   : > { %3900 = vmatpush3.msra.mxu0 %v4485_v4 }
 0x113   : > { %3901 = vmatprep.subr.mxu0 %v4407_v2 }
 0x114   : > { %3902 = vmatpush3.msra.mxu0 %v4503_v6 }
 0x115   : > { %3903 = vmatprep.subr.mxu0 %v4407_v2 }
 0x116   : > { %3904 = vmatpush3.msra.mxu0 %v4517_v8 }
 0x117   : > { %3905 = vmatprep.subr.mxu0 %v4407_v2 }
 0x118   : > { %3906 = vmatpush3.msra.mxu0 %v4533_v10 }
 0x119   : > { %3923 = vmatprep.subr.mxu0 %v4407_v2 }
 0x163   : > { %v847_v45 = vpop.permute.xlu1 %846 }
 0x1cf   : > { %v750_v62 = vpop.f32.mrf.mxu0 }
 0x1d0   : > { %v751_v27 = vadd.f32 %v4698_v61, %v750_v62 }
 0x1d1   : > { %v3876_v28 = vpop.f32.mrf.mxu0 }
 0x1d2   : > { %v754_v29 = vadd.f32 %v751_v27, %v4701_v11 }
 0x1d4   : > { %v756_v30 = vsel %vm755_vm5, %v754_v29, -inf }
 0x1d5   : > { %757 = vmax.xlane.f32.xlu0 %v756_v30 }
 0x25e   : > { %v758_v31 = vpop.xlane.xlu0 %757 }
 0x25f   : > { %v759_v32 = vsub.f32 %v754_v29, %v758_v31 }
 0x261   : > { %v760_v33 = vmul.f32 1.442695, %v759_v32 }
 0x263   : > { %4265 = vpow2.f32 %v760_v33 }
 0x270   : > { %v4266_v34 = vpop.eup %4265 }
 0x271   : > { %v762_v37 = vsel %vm755_vm5, %v4266_v34, 0.0 }
 0x272   : > { %763 = vadd.xlane.f32.xlu0 %v762_v37 }
 0x2fb   : > { %v764_v42 = vpop.xlane.xlu0 %763 }
 0x2fc   : > { %4267 = vrcp.f32 %v764_v42 }
 0x309   : > { %v4268_v43 = vpop.eup %4267 }
 0x30a   : > { %v4738_v44 = vmul.f32 %v4268_v43, %v4266_v34 }
 0x30c   : > { %3882 = vmatmul.mubr.msk.f32.vlgmr.msra.gmra.mxu1 %vm755_vm5, %v4738_v44 }
 0x30d   : > { %3885 = vmatpush3.msk.msra.mxu1 %vm363_vm0, %v4468_v0  ;;  %3894 = vmatprep.mubr.msk.f32.mxu1 %vm4408_vm2, %v4407_v2 }
 0x30e   : > { %3886 = vmatprep.subr.mxu1 %v4407_v2 }
 0x30f   : > { %3887 = vmatpush3.msra.mxu1 %v4480_v3 }
 0x310   : > { %3888 = vmatprep.subr.mxu1 %v4407_v2 }
 0x311   : > { %3889 = vmatpush3.msra.mxu1 %v4498_v5 }
 0x312   : > { %3890 = vmatprep.subr.mxu1 %v4407_v2 }
 0x313   : > { %3891 = vmatpush3.msra.mxu1 %v4512_v7 }
 0x314   : > { %3892 = vmatprep.subr.mxu1 %v4407_v2 }
 0x315   : > { %3893 = vmatpush3.msra.mxu1 %v4526_v9 }
 0x316   : > { %3910 = vmatprep.subr.mxu1 %v4407_v2 }
 0x3cc   : > { %v840_v46 = vpop.f32.mrf.mxu1 }
 0x3cd   : > { %vm849_vm6 = vcmp.gt.f32.partialorder %v840_v46, %v847_v45 }
 0x3ce   : > { %v850_v47 = vsel %vm849_vm6, %v4692_v60, 12  ;;  %v3883_v48 = vpop.f32.mrf.mxu1 }
 0x3cf   : > { %v851_v49 = vsel %vm755_vm5, %v850_v47, 2147483647 }
 0x3d0   : > { %v853_v50 = vshra.s32 %v851_v49, 16  ;;  %v852_v52 = vand.u32 65535, %v851_v49 }
 0x3d2   : > { %v855_v51 = vcvt.s32.f32 %v853_v50  ;;  %v854_v54 = vcvt.s32.f32 %v852_v52 }
 0x3d4   : > { %856 = vmin.xlane.f32.xlu1 %v855_v51 }
 0x45d   : > { %v857_v53 = vpop.xlane.xlu1 %856 }
 0x45e   : > { %vm858_vm7 = vcmp.eq.f32.partialorder %v855_v51, %v857_v53  ;;  %v863_v57 = vcvt.f32.s32 %v857_v53 }
 0x45f   : > { %v859_v56 = vsel %vm858_vm7, %v854_v54, inf }
 0x460   : > { %860 = vmin.xlane.f32.xlu0 %v859_v56  ;;  %v864_v59 = vshll.u32 %v863_v57, 16 }
 0x4e9   : > { %v861_v58 = vpop.xlane.xlu0 %860 }
 0x4ea   : > { %v862_v62 = vcvt.f32.s32 %v861_v58 }
 0x4ec   : > { %v865_v27 = vadd.s32 %v864_v59, %v862_v62 }
 0x4ee   : > { %vm866_vm8 = vcmp.eq.s32.totalorder %v865_v27, 12 }
 0x4ef   : > { %v4757_v28 = vsel %vm866_vm8, 7, %v865_v27 }
 0x4f0   : > { %vm868_vm9 = vcmp.eq.s32.totalorder %v4692_v60, %v4757_v28 }
 0x4f1   : > { %v4762_v29 = vsel %vm868_vm9, 1.0, %v4407_v2  ;;  %vm1890_vm9 = vcmp.eq.s32.totalorder %v4692_v60, 2 }
 0x4f2   : > { %880 = vrot.lane.b32.xlu0 %v4762_v29, %s4411_s25 }
 0x564   : > { %v881_v30 = vpop.permute.xlu0 %880 }
 0x565   : > { %884 = vst.msk [vmem:[#allocation2] sm:$0xff] %vm883_vm10, %v881_v30 }
 0x56c   : > { %v885_v31 = vld [vmem:[#allocation2] sm:$0xff] }
 0x56d   : > { %3895 = vmatmul.mubr.msk.f32.vlgmr.msra.gmra.mxu1 %vm357_vm1, %v885_v31  ;;  %3908 = vmatmul.mubr.msk.f32.vlgmr.msra.gmra.mxu0 %vm357_vm1, %v885_v31 }
 0x56e   : > { %3911 = vmatpush3.msk.msra.mxu1 %vm363_vm0, %v4546_v12  ;;  %3924 = vmatpush3.msk.msra.mxu0 %vm363_vm0, %v4551_v13 }
 0x56f   : > { %3912 = vmatprep.subr.mxu1 %v4407_v2  ;;  %3925 = vmatprep.subr.mxu0 %v4407_v2 }
 0x570   : > { %3913 = vmatpush3.msra.mxu1 %v4560_v14  ;;  %3926 = vmatpush3.msra.mxu0 %v4565_v15 }
 0x571   : > { %3914 = vmatprep.subr.mxu1 %v4407_v2  ;;  %3927 = vmatprep.subr.mxu0 %v4407_v2 }
 0x572   : > { %3915 = vmatpush3.msra.mxu1 %v4576_v16  ;;  %3928 = vmatpush3.msra.mxu0 %v4581_v17 }
 0x573   : > { %3916 = vmatprep.subr.mxu1 %v4407_v2  ;;  %3929 = vmatprep.subr.mxu0 %v4407_v2 }
 0x574   : > { %3917 = vmatpush3.msra.mxu1 %v4590_v18  ;;  %3930 = vmatpush3.msra.mxu0 %v4595_v19 }
 0x575   : > { %3918 = vmatprep.subr.mxu1 %v4407_v2  ;;  %3931 = vmatprep.subr.mxu0 %v4407_v2 }
 0x576   : > { %3919 = vmatpush3.msra.mxu1 %v4604_v20  ;;  %3920 = vmatprep.mubr.msk.f32.mxu1 %vm4408_vm2, %v4407_v2 }
 0x577   : > { %3932 = vmatpush3.msra.mxu0 %v4611_v21  ;;  %3933 = vmatprep.mubr.msk.f32.mxu0 %vm4408_vm2, %v4407_v2 }
 0x578   : > { %3921 = vmatmul.mubr.msk.f32.vlgmr.msra.gmra.mxu1 %vm357_vm1, %v885_v31  ;;  %3934 = vmatmul.mubr.msk.f32.vlgmr.msra.gmra.mxu0 %vm357_vm1, %v885_v31 }
 0x579   : > { %3936 = vmatprep.subr.mxu1 %v4407_v2  ;;  %3942 = vmatprep.mubr.msk.f32.mxu1 %vm4408_vm2, %v4407_v2 }
 0x57a   : > { %3937 = vmatpush3.msra.mxu1 %v4632_v22  ;;  %3945 = vmatprep.subr.mxu0 %v4407_v2 }
 0x57b   : > { %3938 = vmatprep.subr.mxu1 %v4407_v2  ;;  %3946 = vmatpush3.msk.msra.mxu0 %vm363_vm0, %v4710_v38 }
 0x57c   : > { %3939 = vmatpush3.msra.mxu1 %v4637_v23  ;;  %3947 = vmatprep.subr.mxu0 %v4407_v2 }
 0x57d   : > { %3940 = vmatprep.subr.mxu1 %v4407_v2  ;;  %3948 = vmatpush3.msra.mxu0 %v4715_v39 }
 0x57e   : > { %3941 = vmatpush3.msra.mxu1 %v4644_v24  ;;  %3949 = vmatprep.mubr.msk.f32.mxu0 %vm4408_vm2, %v4407_v2 }
 0x57f   : > { %3952 = vmatprep.subr.mxu0 %v4407_v2  ;;  %3965 = vmatprep.subr.mxu1 %v4407_v2 }
 0x62d   : > { %v955_v32 = vpop.f32.mrf.mxu1  ;;  %v1031_v33 = vpop.f32.mrf.mxu0 }
 0x62e   : > { %v956_v34 = vadd.f32 %v4653_v25, %v955_v32  ;;  %v1032_v37 = vadd.f32 %v4658_v26, %v1031_v33 }
 0x62f   : > { %v3896_v40 = vpop.f32.mrf.mxu1  ;;  %v3909_v42 = vpop.f32.mrf.mxu0 }
 0x630   : > { %v3555_v43 = vmul.f32 -1.442695, %v956_v34  ;;  %v3558_v45 = vmul.f32 -1.442695, %v1032_v37  ;;  %v4837_v42 = vsel %vm355_vm11, 0.0, %v4409_v63 }
 0x632   : > { %4269 = vpow2.f32 %v3555_v43 }
 0x633   : > { %4271 = vpow2.f32 %v3558_v45 }
 0x638   : > { %v1107_v46 = vpop.f32.mrf.mxu1  ;;  %v1178_v47 = vpop.f32.mrf.mxu0 }
 0x639   : > { %v1179_v48 = vadd.f32 %v4665_v35, %v1178_v47  ;;  %v1108_v52 = vadd.f32 %v4670_v36, %v1107_v46 }
 0x63a   : > { %v3922_v49 = vpop.f32.mrf.mxu1  ;;  %v3935_v50 = vpop.f32.mrf.mxu0 }
 0x63b   : > { %v3563_v51 = vmul.f32 -1.442695, %v1179_v48 }
 0x63d   : > { %4273 = vpow2.f32 %v3563_v51 }
 0x63e   : > { %4275 = vtanh.f32 %v1108_v52 }
 0x63f   : > { %v4270_v53 = vpop.eup %4269 }
 0x640   : > { %v4272_v54 = vpop.eup %4271  ;;  %v962_v56 = vadd.f32 1.0, %v4270_v53  ;;  %v4412_v53 = vmov 1  }
 0x641   : > { %v1038_v57 = vadd.f32 1.0, %v4272_v54  ;;  %4243 = vset.pattern.permute.xlu1 %v4412_v53 }
 0x642   : > { %4277 = vrcp.f32 %v962_v56 }
 0x643   : > { %4279 = vrcp.f32 %v1038_v57 }
 0x64a   : > { %v4274_v58 = vpop.eup %4273 }
 0x64b   : > { %v4276_v59 = vpop.eup %4275  ;;  %v1185_v31 = vadd.f32 1.0, %v4274_v58 }
 0x64d   : > { %4281 = vrcp.f32 %v1185_v31 }
 0x64f   : > { %v4278_v62 = vpop.eup %4277 }
 0x650   : > { %v4280_v27 = vpop.eup %4279  ;;  %v1189_v30 = vmul.f32 %v4278_v62, %v4276_v59 }
 0x651   : > { %v1188_v32 = vmul.f32 %v4280_v27, %v4674_v55 }
 0x653   : > { %v4817_v33 = vadd.f32 %v1189_v30, %v1188_v32 }
 0x655   : > { %4283 = vtanh.f32 %v4817_v33 }
 0x65a   : > { %v4282_v34 = vpop.eup %4281 }
 0x662   : > { %v4284_v37 = vpop.eup %4283 }
 0x663   : > { %v1192_v40 = vmul.f32 %v4284_v37, %v4282_v34 }
 0x665   : > { %3943 = vmatmul.mubr.msk.f32.vlgmr.msra.gmra.mxu1 %vm680_vm3, %v1192_v40  ;;  %1386 = vst.msk [vmem:[#allocation2] sm:$0xff] %vm680_vm3, %v1192_v40 }
 0x666   : > { %3966 = vmatpush3.msk.msra.mxu1 %vm363_vm0, %v4473_v1  ;;  %3975 = vmatprep.mubr.msk.f32.mxu1 %vm4408_vm2, %v4407_v2 }
 0x667   : > { %3967 = vmatprep.subr.mxu1 %v4407_v2 }
 0x668   : > { %3968 = vmatpush3.msra.mxu1 %v4485_v4 }
 0x669   : > { %3969 = vmatprep.subr.mxu1 %v4407_v2 }
 0x66a   : > { %3970 = vmatpush3.msra.mxu1 %v4503_v6 }
 0x66b   : > { %3971 = vmatprep.subr.mxu1 %v4407_v2 }
 0x66c   : > { %3972 = vmatpush3.msra.mxu1 %v4517_v8 }
 0x66d   : > { %3973 = vmatprep.subr.mxu1 %v4407_v2 }
 0x66e   : > { %3974 = vmatpush3.msra.mxu1 %v4533_v10 }
 0x66f   : > { %3991 = vmatprep.subr.mxu1 %v4407_v2 }
 0x725   : > { %v1262_v55 = vpop.f32.mrf.mxu1 }
 0x726   : > { %v1263_v43 = vadd.f32 %v4698_v61, %v1262_v55 }
 0x727   : > { %v3944_v45 = vpop.f32.mrf.mxu1 }
 0x728   : > { %v1266_v46 = vadd.f32 %v1263_v43, %v4837_v42 }
 0x72a   : > { %v1267_v47 = vsel %vm755_vm5, %v1266_v46, -inf }
 0x72b   : > { %1268 = vmax.xlane.f32.xlu0 %v1267_v47 }
 0x7b4   : > { %v1269_v48 = vpop.xlane.xlu0 %1268 }
 0x7b5   : > { %v1270_v49 = vsub.f32 %v1266_v46, %v1269_v48 }
 0x7b7   : > { %v1271_v50 = vmul.f32 1.442695, %v1270_v49  ;;  %v877_v49 = vsel %vm875_vm14, %v4757_v28, 0 }
 0x7b9   : > { %4285 = vpow2.f32 %v1271_v50 }
 0x7c6   : > { %v4286_v51 = vpop.eup %4285 }
 0x7c7   : > { %v1273_v52 = vsel %vm755_vm5, %v4286_v51, 0.0 }
 0x7c8   : > { %1274 = vadd.xlane.f32.xlu1 %v1273_v52 }
 0x7d9   : > { %1354 = vperm.xlu1 %4243, %v4735_v41  }
 0x851   : > { %v1275_v63 = vpop.xlane.xlu1 %1274 }
 0x852   : > { %4287 = vrcp.f32 %v1275_v63 }
 0x855   : > { %v1355_v57 = vpop.permute.xlu1 %1354 }
 0x85f   : > { %v4288_v54 = vpop.eup %4287 }
 0x860   : > { %v4844_v56 = vmul.f32 %v4288_v54, %v4286_v51 }
 0x862   : > { %3950 = vmatmul.mubr.msk.f32.vlgmr.msra.gmra.mxu0 %vm755_vm5, %v4844_v56 }
 0x863   : > { %3953 = vmatpush3.msk.msra.mxu0 %vm363_vm0, %v4468_v0  ;;  %3962 = vmatprep.mubr.msk.f32.mxu0 %vm4408_vm2, %v4407_v2 }
 0x864   : > { %3954 = vmatprep.subr.mxu0 %v4407_v2 }
 0x865   : > { %3955 = vmatpush3.msra.mxu0 %v4480_v3 }
 0x866   : > { %3956 = vmatprep.subr.mxu0 %v4407_v2 }
 0x867   : > { %3957 = vmatpush3.msra.mxu0 %v4498_v5 }
 0x868   : > { %3958 = vmatprep.subr.mxu0 %v4407_v2 }
 0x869   : > { %3959 = vmatpush3.msra.mxu0 %v4512_v7 }
 0x86a   : > { %3960 = vmatprep.subr.mxu0 %v4407_v2 }
 0x86b   : > { %3961 = vmatpush3.msra.mxu0 %v4526_v9 }
 0x86c   : > { %3978 = vmatprep.subr.mxu0 %v4407_v2 }
 0x922   : > { %v1348_v58 = vpop.f32.mrf.mxu0 }
 0x923   : > { %vm1357_vm12 = vcmp.gt.f32.partialorder %v1348_v58, %v1355_v57 }
 0x924   : > { %v1358_v59 = vsel %vm1357_vm12, %v4692_v60, 12  ;;  %v3951_v62 = vpop.f32.mrf.mxu0 }
 0x925   : > { %v1359_v27 = vsel %vm755_vm5, %v1358_v59, 2147483647 }
 0x926   : > { %v1361_v30 = vshra.s32 %v1359_v27, 16  ;;  %v1360_v32 = vand.u32 65535, %v1359_v27 }
 0x928   : > { %v1363_v31 = vcvt.s32.f32 %v1361_v30  ;;  %v1362_v37 = vcvt.s32.f32 %v1360_v32 }
 0x92a   : > { %1364 = vmin.xlane.f32.xlu1 %v1363_v31 }
 0x9b3   : > { %v1365_v34 = vpop.xlane.xlu1 %1364 }
 0x9b4   : > { %vm1366_vm13 = vcmp.eq.f32.partialorder %v1363_v31, %v1365_v34  ;;  %v1371_v55 = vcvt.f32.s32 %v1365_v34 }
 0x9b5   : > { %v1367_v40 = vsel %vm1366_vm13, %v1362_v37, inf }
 0x9b6   : > { %1368 = vmin.xlane.f32.xlu0 %v1367_v40  ;;  %v1372_v45 = vshll.u32 %v1371_v55, 16 }
 0xa3f   : > { %v1369_v43 = vpop.xlane.xlu0 %1368 }
 0xa40   : > { %v1370_v46 = vcvt.f32.s32 %v1369_v43 }
 0xa42   : > { %v1373_v47 = vadd.s32 %v1372_v45, %v1370_v46 }
 0xa44   : > { %vm1374_vm4 = vcmp.eq.s32.totalorder %v1373_v47, 12 }
 0xa45   : > { %v1375_v48 = vsel %vm1374_vm4, 11, %v1373_v47 }
 0xa46   : > { %vm1376_vm6 = vcmp.eq.s32.totalorder %v4692_v60, %v1375_v48  ;;  %v4871_v50 = vsel %vm1383_vm15, %v1375_v48, %v877_v49 }
 0xa47   : > { %v4874_v51 = vsel %vm1376_vm6, 1.0, %v4407_v2  ;;  %vm2397_vm6 = vcmp.eq.s32.totalorder %v4692_v60, 3 }
 0xa48   : > { %1388 = vrot.lane.b32.xlu0 %v4874_v51, %s4411_s25 }
 0xaba   : > { %v1389_v52 = vpop.permute.xlu0 %1388 }
 0xabb   : > { %1391 = vst.msk [vmem:[#allocation2] sm:$0xff] %vm883_vm10, %v1389_v52 }
 0xac2   : > { %v1392_v53 = vld [vmem:[#allocation2] sm:$0xff] }
 0xac3   : > { %3963 = vmatmul.mubr.msk.f32.vlgmr.msra.gmra.mxu0 %vm357_vm1, %v1392_v53  ;;  %3976 = vmatmul.mubr.msk.f32.vlgmr.msra.gmra.mxu1 %vm357_vm1, %v1392_v53 }
 0xac4   : > { %3979 = vmatpush3.msk.msra.mxu0 %vm363_vm0, %v4546_v12  ;;  %3992 = vmatpush3.msk.msra.mxu1 %vm363_vm0, %v4551_v13 }
 0xac5   : > { %3980 = vmatprep.subr.mxu0 %v4407_v2  ;;  %3993 = vmatprep.subr.mxu1 %v4407_v2 }
 0xac6   : > { %3981 = vmatpush3.msra.mxu0 %v4560_v14  ;;  %3994 = vmatpush3.msra.mxu1 %v4565_v15 }
 0xac7   : > { %3982 = vmatprep.subr.mxu0 %v4407_v2  ;;  %3995 = vmatprep.subr.mxu1 %v4407_v2 }
 0xac8   : > { %3983 = vmatpush3.msra.mxu0 %v4576_v16  ;;  %3996 = vmatpush3.msra.mxu1 %v4581_v17 }
 0xac9   : > { %3984 = vmatprep.subr.mxu0 %v4407_v2  ;;  %3997 = vmatprep.subr.mxu1 %v4407_v2 }
 0xaca   : > { %3985 = vmatpush3.msra.mxu0 %v4590_v18  ;;  %3998 = vmatpush3.msra.mxu1 %v4595_v19 }
 0xacb   : > { %3986 = vmatprep.subr.mxu0 %v4407_v2  ;;  %3999 = vmatprep.subr.mxu1 %v4407_v2 }
 0xacc   : > { %3987 = vmatpush3.msra.mxu0 %v4604_v20  ;;  %3988 = vmatprep.mubr.msk.f32.mxu0 %vm4408_vm2, %v4407_v2 }
 0xacd   : > { %4000 = vmatpush3.msra.mxu1 %v4611_v21  ;;  %4001 = vmatprep.mubr.msk.f32.mxu1 %vm4408_vm2, %v4407_v2 }
 0xace   : > { %3989 = vmatmul.mubr.msk.f32.vlgmr.msra.gmra.mxu0 %vm357_vm1, %v1392_v53  ;;  %4002 = vmatmul.mubr.msk.f32.vlgmr.msra.gmra.mxu1 %vm357_vm1, %v1392_v53 }
 0xacf   : > { %4004 = vmatprep.subr.mxu0 %v4407_v2  ;;  %4010 = vmatprep.mubr.msk.f32.mxu0 %vm4408_vm2, %v4407_v2 }
 0xad0   : > { %4005 = vmatpush3.msra.mxu0 %v4632_v22  ;;  %4013 = vmatprep.subr.mxu1 %v4407_v2 }
 0xad1   : > { %4006 = vmatprep.subr.mxu0 %v4407_v2  ;;  %4014 = vmatpush3.msk.msra.mxu1 %vm363_vm0, %v4710_v38 }
 0xad2   : > { %4007 = vmatpush3.msra.mxu0 %v4637_v23  ;;  %4015 = vmatprep.subr.mxu1 %v4407_v2 }
 0xad3   : > { %4008 = vmatprep.subr.mxu0 %v4407_v2  ;;  %4016 = vmatpush3.msra.mxu1 %v4715_v39 }
 0xad4   : > { %4009 = vmatpush3.msra.mxu0 %v4644_v24  ;;  %4017 = vmatprep.mubr.msk.f32.mxu1 %vm4408_vm2, %v4407_v2 }
 0xad5   : > { %4020 = vmatprep.subr.mxu1 %v4407_v2  ;;  %4033 = vmatprep.subr.mxu0 %v4407_v2 }
 0xb83   : > { %v1462_v28 = vpop.f32.mrf.mxu0  ;;  %v1538_v63 = vpop.f32.mrf.mxu1 }
 0xb84   : > { %v1463_v54 = vadd.f32 %v4653_v25, %v1462_v28  ;;  %v1539_v57 = vadd.f32 %v4658_v26, %v1538_v63 }
 0xb85   : > { %v3964_v58 = vpop.f32.mrf.mxu0  ;;  %v3977_v59 = vpop.f32.mrf.mxu1 }
 0xb86   : > { %v3570_v62 = vmul.f32 -1.442695, %v1463_v54  ;;  %v3573_v27 = vmul.f32 -1.442695, %v1539_v57 }
 0xb88   : > { %4289 = vpow2.f32 %v3570_v62 }
 0xb89   : > { %4291 = vpow2.f32 %v3573_v27 }
 0xb8e   : > { %v1614_v30 = vpop.f32.mrf.mxu0  ;;  %v1685_v31 = vpop.f32.mrf.mxu1 }
 0xb8f   : > { %v1686_v32 = vadd.f32 %v4665_v35, %v1685_v31  ;;  %v1615_v55 = vadd.f32 %v4670_v36, %v1614_v30 }
 0xb90   : > { %v3990_v34 = vpop.f32.mrf.mxu0  ;;  %v4003_v37 = vpop.f32.mrf.mxu1 }
 0xb91   : > { %v3578_v40 = vmul.f32 -1.442695, %v1686_v32 }
 0xb93   : > { %4293 = vpow2.f32 %v3578_v40 }
 0xb94   : > { %4295 = vtanh.f32 %v1615_v55 }
 0xb95   : > { %v4290_v43 = vpop.eup %4289 }
 0xb96   : > { %v4292_v45 = vpop.eup %4291  ;;  %v1469_v46 = vadd.f32 1.0, %v4290_v43 }
 0xb97   : > { %v1545_v47 = vadd.f32 1.0, %v4292_v45 }
 0xb98   : > { %4297 = vrcp.f32 %v1469_v46 }
 0xb99   : > { %4299 = vrcp.f32 %v1545_v47 }
 0xba0   : > { %v4294_v48 = vpop.eup %4293 }
 0xba1   : > { %v4296_v49 = vpop.eup %4295  ;;  %v1692_v63 = vadd.f32 1.0, %v4294_v48 }
 0xba3   : > { %4301 = vrcp.f32 %v1692_v63 }
 0xba5   : > { %v4298_v52 = vpop.eup %4297 }
 0xba6   : > { %v4300_v53 = vpop.eup %4299  ;;  %v1696_v28 = vmul.f32 %v4298_v52, %v4296_v49 }
 0xba7   : > { %v1695_v54 = vmul.f32 %v4300_v53, %v4817_v33 }
 0xba9   : > { %v4929_v57 = vadd.f32 %v1696_v28, %v1695_v54 }
 0xbab   : > { %4303 = vtanh.f32 %v4929_v57 }
 0xbb0   : > { %v4302_v58 = vpop.eup %4301 }
 0xbb8   : > { %v4304_v59 = vpop.eup %4303 }
 0xbb9   : > { %v1699_v62 = vmul.f32 %v4304_v59, %v4302_v58 }
 0xbbb   : > { %4011 = vmatmul.mubr.msk.f32.vlgmr.msra.gmra.mxu0 %vm680_vm3, %v1699_v62  ;;  %1893 = vst.msk [vmem:[#allocation2] sm:$0xff] %vm680_vm3, %v1699_v62 }
 0xbbc   : > { %4034 = vmatpush3.msk.msra.mxu0 %vm363_vm0, %v4473_v1  ;;  %4043 = vmatprep.mubr.msk.f32.mxu0 %vm4408_vm2, %v4407_v2 }
 0xbbd   : > { %4035 = vmatprep.subr.mxu0 %v4407_v2 }
 0xbbe   : > { %4036 = vmatpush3.msra.mxu0 %v4485_v4 }
 0xbbf   : > { %4037 = vmatprep.subr.mxu0 %v4407_v2 }
 0xbc0   : > { %4038 = vmatpush3.msra.mxu0 %v4503_v6 }
 0xbc1   : > { %4039 = vmatprep.subr.mxu0 %v4407_v2 }
 0xbc2   : > { %4040 = vmatpush3.msra.mxu0 %v4517_v8 }
 0xbc3   : > { %4041 = vmatprep.subr.mxu0 %v4407_v2 }
 0xbc4   : > { %4042 = vmatpush3.msra.mxu0 %v4533_v10  ;;  %v4413_v10 = vmov 2  }
 0xbc5   : > { %4059 = vmatprep.subr.mxu0 %v4407_v2  ;;  %4244 = vset.pattern.permute.xlu1 %v4413_v10 }
 0xc7b   : > { %v1769_v1 = vpop.f32.mrf.mxu0 }
 0xc7c   : > { %v1770_v33 = vadd.f32 %v4698_v61, %v1769_v1 }
 0xc7d   : > { %v4012_v27 = vpop.f32.mrf.mxu0 }
 0xc7e   : > { %v1773_v4 = vadd.f32 %v1770_v33, %v4701_v11 }
 0xc80   : > { %v1774_v30 = vsel %vm755_vm5, %v1773_v4, -inf }
 0xc81   : > { %1775 = vmax.xlane.f32.xlu0 %v1774_v30 }
 0xd0a   : > { %v1776_v6 = vpop.xlane.xlu0 %1775 }
 0xd0b   : > { %v1777_v31 = vsub.f32 %v1773_v4, %v1776_v6 }
 0xd0d   : > { %v1778_v32 = vmul.f32 1.442695, %v1777_v31 }
 0xd0f   : > { %4305 = vpow2.f32 %v1778_v32 }
 0xd1c   : > { %v4306_v8 = vpop.eup %4305 }
 0xd1d   : > { %v1780_v34 = vsel %vm755_vm5, %v4306_v8, 0.0 }
 0xd1e   : > { %1781 = vadd.xlane.f32.xlu1 %v1780_v34 }
 0xd2f   : > { %1861 = vperm.xlu1 %4244, %v4735_v41  }
 0xda7   : > { %v1782_v37 = vpop.xlane.xlu1 %1781 }
 0xda8   : > { %4307 = vrcp.f32 %v1782_v37 }
 0xdb5   : > { %v4308_v40 = vpop.eup %4307 }
 0xdb6   : > { %v4952_v55 = vmul.f32 %v4308_v40, %v4306_v8  ;;  %v5042_v40 = vld [vmem:[%s5454_s0 + $0x48] sm:$0xf] }
 0xdb8   : > { %4018 = vmatmul.mubr.msk.f32.vlgmr.msra.gmra.mxu1 %vm755_vm5, %v4952_v55 }
 0xdb9   : > { %4021 = vmatpush3.msk.msra.mxu1 %vm363_vm0, %v4468_v0  ;;  %4030 = vmatprep.mubr.msk.f32.mxu1 %vm4408_vm2, %v4407_v2  ;;  %v1862_v0 = vpop.permute.xlu1 %1861 }
 0xdba   : > { %4022 = vmatprep.subr.mxu1 %v4407_v2 }
 0xdbb   : > { %4023 = vmatpush3.msra.mxu1 %v4480_v3 }
 0xdbc   : > { %4024 = vmatprep.subr.mxu1 %v4407_v2 }
 0xdbd   : > { %4025 = vmatpush3.msra.mxu1 %v4498_v5 }
 0xdbe   : > { %4026 = vmatprep.subr.mxu1 %v4407_v2 }
 0xdbf   : > { %4027 = vmatpush3.msra.mxu1 %v4512_v7 }
 0xdc0   : > { %4028 = vmatprep.subr.mxu1 %v4407_v2 }
 0xdc1   : > { %4029 = vmatpush3.msra.mxu1 %v4526_v9 }
 0xdc2   : > { %4046 = vmatprep.subr.mxu1 %v4407_v2 }
 0xe78   : > { %v1855_v43 = vpop.f32.mrf.mxu1 }
 0xe79   : > { %vm1864_vm7 = vcmp.gt.f32.partialorder %v1855_v43, %v1862_v0  ;;  %v5059_v0 = vld [vmem:[%s5454_s0 + $0x38] sm:$0xff]  ;;  %v5066_v43 = vld [vmem:[%s5454_s0 + $0x30] sm:$0xff] }
 0xe7a   : > { %v1865_v45 = vsel %vm1864_vm7, %v4692_v60, 12  ;;  %v4019_v3 = vpop.f32.mrf.mxu1 }
 0xe7b   : > { %v1866_v46 = vsel %vm755_vm5, %v1865_v45, 2147483647  ;;  %v5073_v45 = vld [vmem:[%s5454_s0 + $0x28] sm:$0xff] }
 0xe7c   : > { %v1868_v47 = vshra.s32 %v1866_v46, 16  ;;  %v1867_v48 = vand.u32 65535, %v1866_v46 }
 0xe7e   : > { %v1870_v5 = vcvt.s32.f32 %v1868_v47  ;;  %v1869_v7 = vcvt.s32.f32 %v1867_v48 }
 0xe80   : > { %1871 = vmin.xlane.f32.xlu1 %v1870_v5 }
 0xf09   : > { %v1872_v49 = vpop.xlane.xlu1 %1871 }
 0xf0a   : > { %vm1873_vm8 = vcmp.eq.f32.partialorder %v1870_v5, %v1872_v49  ;;  %v1878_v9 = vcvt.f32.s32 %v1872_v49 }
 0xf0b   : > { %v1874_v52 = vsel %vm1873_vm8, %v1869_v7, inf }
 0xf0c   : > { %1875 = vmin.xlane.f32.xlu0 %v1874_v52  ;;  %v1879_v28 = vshll.u32 %v1878_v9, 16 }
 0xf95   : > { %v1876_v53 = vpop.xlane.xlu0 %1875 }
 0xf96   : > { %v1877_v63 = vcvt.f32.s32 %v1876_v53 }
 0xf98   : > { %v1880_v54 = vadd.s32 %v1879_v28, %v1877_v63  ;;  %v4414_v28 = vmov 3  }
 0xf99   : > { %4245 = vset.pattern.permute.xlu1 %v4414_v28 }
 0xf9a   : > { %vm1881_vm11 = vcmp.eq.s32.totalorder %v1880_v54, 12 }
 0xf9b   : > { %v1882_v58 = vsel %vm1881_vm11, 7, %v1880_v54 }
 0xf9c   : > { %vm1883_vm12 = vcmp.eq.s32.totalorder %v4692_v60, %v1882_v58  ;;  %v4976_v59 = vsel %vm1890_vm9, %v1882_v58, %v4871_v50  ;;  %v5089_v58 = vld [vmem:[%s5454_s0 + $0x20] sm:$0xf] }
 0xf9d   : > { %v4979_v62 = vsel %vm1883_vm12, 1.0, %v4407_v2 }
 0xf9e   : > { %1895 = vrot.lane.b32.xlu0 %v4979_v62, %s4411_s25 }
0x1010   : > { %v1896_v1 = vpop.permute.xlu0 %1895 }
0x1011   : > { %1898 = vst.msk [vmem:[#allocation2] sm:$0xff] %vm883_vm10, %v1896_v1  ;;  %v5106_v1 = vld [vmem:[%s5454_s0 + $0x10] sm:$0xff] }
0x1018   : > { %v1899_v33 = vld [vmem:[#allocation2] sm:$0xff] }
0x1019   : > { %4031 = vmatmul.mubr.msk.f32.vlgmr.msra.gmra.mxu1 %vm357_vm1, %v1899_v33  ;;  %4044 = vmatmul.mubr.msk.f32.vlgmr.msra.gmra.mxu0 %vm357_vm1, %v1899_v33 }
0x101a   : > { %4047 = vmatpush3.msk.msra.mxu1 %vm363_vm0, %v4546_v12  ;;  %4060 = vmatpush3.msk.msra.mxu0 %vm363_vm0, %v4551_v13 }
0x101b   : > { %4048 = vmatprep.subr.mxu1 %v4407_v2  ;;  %4061 = vmatprep.subr.mxu0 %v4407_v2 }
0x101c   : > { %4049 = vmatpush3.msra.mxu1 %v4560_v14  ;;  %4062 = vmatpush3.msra.mxu0 %v4565_v15 }
0x101d   : > { %4050 = vmatprep.subr.mxu1 %v4407_v2  ;;  %4063 = vmatprep.subr.mxu0 %v4407_v2 }
0x101e   : > { %4051 = vmatpush3.msra.mxu1 %v4576_v16  ;;  %4064 = vmatpush3.msra.mxu0 %v4581_v17 }
0x101f   : > { %4052 = vmatprep.subr.mxu1 %v4407_v2  ;;  %4065 = vmatprep.subr.mxu0 %v4407_v2 }
0x1020   : > { %4053 = vmatpush3.msra.mxu1 %v4590_v18  ;;  %4066 = vmatpush3.msra.mxu0 %v4595_v19 }
0x1021   : > { %4054 = vmatprep.subr.mxu1 %v4407_v2  ;;  %4067 = vmatprep.subr.mxu0 %v4407_v2 }
0x1022   : > { %4055 = vmatpush3.msra.mxu1 %v4604_v20  ;;  %4056 = vmatprep.mubr.msk.f32.mxu1 %vm4408_vm2, %v4407_v2 }
0x1023   : > { %4068 = vmatpush3.msra.mxu0 %v4611_v21  ;;  %4069 = vmatprep.mubr.msk.f32.mxu0 %vm4408_vm2, %v4407_v2 }
0x1024   : > { %4057 = vmatmul.mubr.msk.f32.vlgmr.msra.gmra.mxu1 %vm357_vm1, %v1899_v33  ;;  %4070 = vmatmul.mubr.msk.f32.vlgmr.msra.gmra.mxu0 %vm357_vm1, %v1899_v33  ;;  %v5113_v33 = vld [vmem:[%s5454_s0 + $0x8] sm:$0xff] }
0x1025   : > { %4072 = vmatprep.subr.mxu1 %v4407_v2  ;;  %4078 = vmatprep.mubr.msk.f32.mxu1 %vm4408_vm2, %v4407_v2 }
0x1026   : > { %4073 = vmatpush3.msra.mxu1 %v4632_v22  ;;  %4081 = vmatprep.subr.mxu0 %v4407_v2 }
0x1027   : > { %4074 = vmatprep.subr.mxu1 %v4407_v2  ;;  %4082 = vmatpush3.msk.msra.mxu0 %vm363_vm0, %v4710_v38 }
0x1028   : > { %4075 = vmatpush3.msra.mxu1 %v4637_v23  ;;  %4083 = vmatprep.subr.mxu0 %v4407_v2 }
0x1029   : > { %4076 = vmatprep.subr.mxu1 %v4407_v2  ;;  %4084 = vmatpush3.msra.mxu0 %v4715_v39 }
0x102a   : > { %4077 = vmatpush3.msra.mxu1 %v4644_v24  ;;  %4085 = vmatprep.mubr.msk.f32.mxu0 %vm4408_vm2, %v4407_v2 }
0x102b   : > { %4088 = vmatprep.subr.mxu0 %v4407_v2  ;;  %4101 = vmatprep.subr.mxu1 %v4407_v2 }
0x10d9   : > { %v1969_v12 = vpop.f32.mrf.mxu1  ;;  %v2045_v13 = vpop.f32.mrf.mxu0 }
0x10da   : > { %v1970_v14 = vadd.f32 %v4653_v25, %v1969_v12  ;;  %v2046_v15 = vadd.f32 %v4658_v26, %v2045_v13  ;;  %v5120_v12 = vld [vmem:[%s5454_s0] sm:$0xff] }
0x10db   : > { %v4032_v16 = vpop.f32.mrf.mxu1  ;;  %v4045_v17 = vpop.f32.mrf.mxu0 }
0x10dc   : > { %v3585_v18 = vmul.f32 -1.442695, %v1970_v14  ;;  %v3588_v19 = vmul.f32 -1.442695, %v2046_v15 }
0x10de   : > { %4309 = vpow2.f32 %v3585_v18 }
0x10df   : > { %4311 = vpow2.f32 %v3588_v19 }
0x10e4   : > { %v2121_v20 = vpop.f32.mrf.mxu1  ;;  %v2192_v21 = vpop.f32.mrf.mxu0 }
0x10e5   : > { %v2193_v22 = vadd.f32 %v4665_v35, %v2192_v21  ;;  %v2122_v39 = vadd.f32 %v4670_v36, %v2121_v20 }
0x10e6   : > { %v4058_v23 = vpop.f32.mrf.mxu1  ;;  %v4071_v24 = vpop.f32.mrf.mxu0 }
0x10e7   : > { %v3593_v38 = vmul.f32 -1.442695, %v2193_v22 }
0x10e9   : > { %4313 = vpow2.f32 %v3593_v38 }
0x10ea   : > { %4315 = vtanh.f32 %v2122_v39 }
0x10eb   : > { %v4310_v50 = vpop.eup %4309 }
0x10ec   : > { %v4312_v27 = vpop.eup %4311  ;;  %v1976_v25 = vadd.f32 1.0, %v4310_v50 }
0x10ed   : > { %v2052_v26 = vadd.f32 1.0, %v4312_v27 }
0x10ee   : > { %4317 = vrcp.f32 %v1976_v25 }
0x10ef   : > { %4319 = vrcp.f32 %v2052_v26 }
0x10f6   : > { %v4314_v4 = vpop.eup %4313 }
0x10f7   : > { %v4316_v30 = vpop.eup %4315  ;;  %v2199_v8 = vadd.f32 1.0, %v4314_v4 }
0x10f9   : > { %4321 = vrcp.f32 %v2199_v8  ;;  %v5166_v8 = vld [vmem:[%s5454_s0 + $0x90] sm:$0xff] }
0x10fb   : > { %v4318_v6 = vpop.eup %4317 }
0x10fc   : > { %v4320_v31 = vpop.eup %4319  ;;  %v2203_v32 = vmul.f32 %v4318_v6, %v4316_v30 }
0x10fd   : > { %v2202_v35 = vmul.f32 %v4320_v31, %v4929_v57  ;;  %v5052_v57 = vld [vmem:[%s5454_s0 + $0x40] sm:$0xff]  ;;  %v5144_v31 = vld [vmem:[%s5454_s0 + $0x70] sm:$0xf] }
0x10ff   : > { %v5034_v34 = vadd.f32 %v2203_v32, %v2202_v35  ;;  %v5160_v32 = vld [vmem:[%s5454_s0 + $0x68] sm:$0xff]  ;;  %v5174_v35 = vld [vmem:[%s5454_s0 + $0x60] sm:$0xff] }
0x1101   : > { %4323 = vtanh.f32 %v5034_v34 }
0x1106   : > { %v4322_v36 = vpop.eup %4321 }
0x110e   : > { %v4324_v10 = vpop.eup %4323 }
0x110f   : > { %v2206_v37 = vmul.f32 %v4324_v10, %v4322_v36  ;;  %v5180_v36 = vld [vmem:[%s5454_s0 + $0x88] sm:$0xff]  ;;  %v5188_v10 = vld [vmem:[%s5454_s0 + $0x58] sm:$0xff] }
0x1111   : > { %4079 = vmatmul.mubr.msk.f32.vlgmr.msra.gmra.mxu1 %vm680_vm3, %v2206_v37  ;;  %2400 = vst.msk [vmem:[#allocation2] sm:$0xff] %vm680_vm3, %v2206_v37  ;;  %v5194_v37 = vld [vmem:[%s5454_s0 + $0x80] sm:$0xff] }
0x1112   : > { %4102 = vmatpush3.msk.msra.mxu1 %vm363_vm0, %v5042_v40  ;;  %4111 = vmatprep.mubr.msk.f32.mxu1 %vm4408_vm2, %v4407_v2 }
0x1113   : > { %4103 = vmatprep.subr.mxu1 %v4407_v2 }
0x1114   : > { %4104 = vmatpush3.msra.mxu1 %v5052_v57 }
0x1115   : > { %4105 = vmatprep.subr.mxu1 %v4407_v2 }
0x1116   : > { %4106 = vmatpush3.msra.mxu1 %v5059_v0 }
0x1117   : > { %4107 = vmatprep.subr.mxu1 %v4407_v2 }
0x1118   : > { %4108 = vmatpush3.msra.mxu1 %v5066_v43 }
0x1119   : > { %4109 = vmatprep.subr.mxu1 %v4407_v2 }
0x111a   : > { %4110 = vmatpush3.msra.mxu1 %v5073_v45 }
0x111b   : > { %4127 = vmatprep.subr.mxu1 %v4407_v2 }
0x11d1   : > { %v2276_v3 = vpop.f32.mrf.mxu1 }
0x11d2   : > { %v2277_v46 = vadd.f32 %v4698_v61, %v2276_v3  ;;  %v5202_v3 = vld [vmem:[%s5454_s0 + $0x50] sm:$0xff] }
0x11d3   : > { %v4080_v47 = vpop.f32.mrf.mxu1 }
0x11d4   : > { %v2280_v5 = vadd.f32 %v2277_v46, %v4837_v42  ;;  %v5210_v46 = vld [vmem:[%s5454_s0 + $0x78] sm:$0xff]  ;;  %v5223_v47 = vld [vmem:[%s5456_s2 + $0x10] sm:$0xff] }
0x11d6   : > { %v2281_v48 = vsel %vm755_vm5, %v2280_v5, -inf }
0x11d7   : > { %2282 = vmax.xlane.f32.xlu0 %v2281_v48  ;;  %v5238_v48 = vld [vmem:[%s5456_s2 + $0x8] sm:$0xff] }
0x1260   : > { %v2283_v49 = vpop.xlane.xlu0 %2282 }
0x1261   : > { %v2284_v7 = vsub.f32 %v2280_v5, %v2283_v49  ;;  %v5231_v5 = vld [vmem:[%s5458_s4 + $0x8] sm:$0xf]  ;;  %v5246_v49 = vld [vmem:[%s5458_s4] sm:$0xff] }
0x1263   : > { %v2285_v52 = vmul.f32 1.442695, %v2284_v7  ;;  %v5252_v7 = vld [vmem:[%s5456_s2] sm:$0xff] }
0x1265   : > { %4325 = vpow2.f32 %v2285_v52 }
0x1272   : > { %v4326_v9 = vpop.eup %4325 }
0x1273   : > { %v2287_v53 = vsel %vm755_vm5, %v4326_v9, 0.0 }
0x1274   : > { %2288 = vadd.xlane.f32.xlu1 %v2287_v53  ;;  %v5262_v53 = vld [vmem:[%s5455_s1] ss:$0 sm:$0xff] }
0x1285   : > { %2368 = vperm.xlu1 %4245, %v4735_v41   ;;  %v5099_v41 = vld [vmem:[%s5454_s0 + $0x18] sm:$0xff] }
0x12fd   : > { %v2289_v63 = vpop.xlane.xlu1 %2288 }
0x12fe   : > { %4327 = vrcp.f32 %v2289_v63  ;;  %v5268_v63 = vld [vmem:[%s5455_s1 + $0x1] ss:$0 sm:$0xff] }
0x1301   : > { %v2369_v13 = vpop.permute.xlu1 %2368 }
0x130b   : > { %v4328_v61 = vpop.eup %4327 }
0x130c   : > { %v5082_v54 = vmul.f32 %v4328_v61, %v4326_v9 }
0x130e   : > { %4086 = vmatmul.mubr.msk.f32.vlgmr.msra.gmra.mxu0 %vm755_vm5, %v5082_v54 }
0x130f   : > { %4089 = vmatpush3.msk.msra.mxu0 %vm363_vm0, %v5089_v58  ;;  %4098 = vmatprep.mubr.msk.f32.mxu0 %vm4408_vm2, %v4407_v2 }
0x1310   : > { %4090 = vmatprep.subr.mxu0 %v4407_v2 }
0x1311   : > { %4091 = vmatpush3.msra.mxu0 %v5099_v41 }
0x1312   : > { %4092 = vmatprep.subr.mxu0 %v4407_v2 }
0x1313   : > { %4093 = vmatpush3.msra.mxu0 %v5106_v1 }
0x1314   : > { %4094 = vmatprep.subr.mxu0 %v4407_v2 }
0x1315   : > { %4095 = vmatpush3.msra.mxu0 %v5113_v33 }
0x1316   : > { %4096 = vmatprep.subr.mxu0 %v4407_v2 }
0x1317   : > { %4097 = vmatpush3.msra.mxu0 %v5120_v12 }
0x1318   : > { %4114 = vmatprep.subr.mxu0 %v4407_v2 }
0x13ce   : > { %v2362_v14 = vpop.f32.mrf.mxu0 }
0x13cf   : > { %vm2371_vm13 = vcmp.gt.f32.partialorder %v2362_v14, %v2369_v13 }
0x13d0   : > { %v2372_v15 = vsel %vm2371_vm13, %v4692_v60, 12  ;;  %v4087_v16 = vpop.f32.mrf.mxu0  ;;  %vm2904_vm13 = vcmp.eq.s32.totalorder %v4692_v60, 4 }
0x13d1   : > { %v2373_v17 = vsel %vm755_vm5, %v2372_v15, 2147483647 }
0x13d2   : > { %v2375_v18 = vshra.s32 %v2373_v17, 16  ;;  %v2374_v20 = vand.u32 65535, %v2373_v17 }
0x13d4   : > { %v2377_v19 = vcvt.s32.f32 %v2375_v18  ;;  %v2376_v22 = vcvt.s32.f32 %v2374_v20 }
0x13d6   : > { %2378 = vmin.xlane.f32.xlu1 %v2377_v19 }
0x145f   : > { %v2379_v21 = vpop.xlane.xlu1 %2378 }
0x1460   : > { %vm2380_vm4 = vcmp.eq.f32.partialorder %v2377_v19, %v2379_v21  ;;  %v2385_v24 = vcvt.f32.s32 %v2379_v21  ;;  %v5274_v19 = vld [vmem:[%s5455_s1 + $0x3] ss:$0 sm:$0xff] }
0x1461   : > { %v2381_v23 = vsel %vm2380_vm4, %v2376_v22, inf }
0x1462   : > { %2382 = vmin.xlane.f32.xlu0 %v2381_v23  ;;  %v2386_v39 = vshll.u32 %v2385_v24, 16  ;;  %v5280_v24 = vld [vmem:[%s5455_s1 + $0x2] ss:$0 sm:$0xff] }
0x14eb   : > { %v2383_v38 = vpop.xlane.xlu0 %2382 }
0x14ec   : > { %v2384_v50 = vcvt.f32.s32 %v2383_v38 }
0x14ee   : > { %v2387_v27 = vadd.s32 %v2386_v39, %v2384_v50 }
0x14f0   : > { %vm2388_vm7 = vcmp.eq.s32.totalorder %v2387_v27, 12 }
0x14f1   : > { %v2389_v25 = vsel %vm2388_vm7, 11, %v2387_v27 }
0x14f2   : > { %vm2390_vm8 = vcmp.eq.s32.totalorder %v4692_v60, %v2389_v25  ;;  %v5131_v26 = vsel %vm2397_vm6, %v2389_v25, %v4976_v59  ;;  %v5151_v59 = vld [vmem:[%s5454_s0 + $0x98] sm:$0xf] }
0x14f3   : > { %v5134_v4 = vsel %vm2390_vm8, 1.0, %v4407_v2  ;;  %vm3420_vm8 = vcmask 48128  }
0x14f4   : > { %2402 = vrot.lane.b32.xlu0 %v5134_v4, %s4411_s25 }
0x1566   : > { %v2403_v30 = vpop.permute.xlu0 %2402 }
0x1567   : > { %2405 = vst.msk [vmem:[#allocation2] sm:$0xff] %vm883_vm10, %v2403_v30 }
0x156e   : > { %v2406_v6 = vld [vmem:[#allocation2] sm:$0xff] }
0x156f   : > { %4099 = vmatmul.mubr.msk.f32.vlgmr.msra.gmra.mxu0 %vm357_vm1, %v2406_v6  ;;  %4112 = vmatmul.mubr.msk.f32.vlgmr.msra.gmra.mxu1 %vm357_vm1, %v2406_v6 }
0x1570   : > { %4115 = vmatpush3.msk.msra.mxu0 %vm363_vm0, %v5144_v31  ;;  %4128 = vmatpush3.msk.msra.mxu1 %vm363_vm0, %v5151_v59 }
0x1571   : > { %4116 = vmatprep.subr.mxu0 %v4407_v2  ;;  %4129 = vmatprep.subr.mxu1 %v4407_v2 }
0x1572   : > { %4117 = vmatpush3.msra.mxu0 %v5160_v32  ;;  %4130 = vmatpush3.msra.mxu1 %v5166_v8 }
0x1573   : > { %4118 = vmatprep.subr.mxu0 %v4407_v2  ;;  %4131 = vmatprep.subr.mxu1 %v4407_v2 }
0x1574   : > { %4119 = vmatpush3.msra.mxu0 %v5174_v35  ;;  %4132 = vmatpush3.msra.mxu1 %v5180_v36 }
0x1575   : > { %4120 = vmatprep.subr.mxu0 %v4407_v2  ;;  %4133 = vmatprep.subr.mxu1 %v4407_v2 }
0x1576   : > { %4121 = vmatpush3.msra.mxu0 %v5188_v10  ;;  %4134 = vmatpush3.msra.mxu1 %v5194_v37 }
0x1577   : > { %4122 = vmatprep.subr.mxu0 %v4407_v2  ;;  %4135 = vmatprep.subr.mxu1 %v4407_v2 }
0x1578   : > { %4123 = vmatpush3.msra.mxu0 %v5202_v3  ;;  %4124 = vmatprep.mubr.msk.f32.mxu0 %vm4408_vm2, %v4407_v2 }
0x1579   : > { %4136 = vmatpush3.msra.mxu1 %v5210_v46  ;;  %4137 = vmatprep.mubr.msk.f32.mxu1 %vm4408_vm2, %v4407_v2 }
0x157a   : > { %4125 = vmatmul.mubr.msk.f32.vlgmr.msra.gmra.mxu0 %vm357_vm1, %v2406_v6  ;;  %4138 = vmatmul.mubr.msk.f32.vlgmr.msra.gmra.mxu1 %vm357_vm1, %v2406_v6 }
0x157b   : > { %4140 = vmatprep.subr.mxu0 %v4407_v2  ;;  %4146 = vmatprep.mubr.msk.f32.mxu0 %vm4408_vm2, %v4407_v2 }
0x157c   : > { %4141 = vmatpush3.msra.mxu0 %v5223_v47  ;;  %4149 = vmatprep.subr.mxu1 %v4407_v2 }
0x157d   : > { %4142 = vmatprep.subr.mxu0 %v4407_v2  ;;  %4150 = vmatpush3.msk.msra.mxu1 %vm363_vm0, %v5231_v5 }
0x157e   : > { %4143 = vmatpush3.msra.mxu0 %v5238_v48  ;;  %4151 = vmatprep.subr.mxu1 %v4407_v2 }
0x157f   : > { %4144 = vmatprep.subr.mxu0 %v4407_v2  ;;  %4152 = vmatpush3.msra.mxu1 %v5246_v49 }
0x1580   : > { %4145 = vmatpush3.msra.mxu0 %v5252_v7  ;;  %4153 = vmatprep.mubr.msk.f32.mxu1 %vm4408_vm2, %v4407_v2 }
0x1581   : > { %4156 = vmatprep.subr.mxu1 %v4407_v2  ;;  %4169 = vmatprep.subr.mxu0 %v4407_v2 }
0x162f   : > { %v2476_v52 = vpop.f32.mrf.mxu0  ;;  %v2552_v9 = vpop.f32.mrf.mxu1 }
0x1630   : > { %v2477_v28 = vadd.f32 %v5262_v53, %v2476_v52  ;;  %v2553_v61 = vadd.f32 %v5268_v63, %v2552_v9 }
0x1631   : > { %v4100_v13 = vpop.f32.mrf.mxu0  ;;  %v4113_v14 = vpop.f32.mrf.mxu1 }
0x1632   : > { %v3600_v15 = vmul.f32 -1.442695, %v2477_v28  ;;  %v3603_v16 = vmul.f32 -1.442695, %v2553_v61 }
0x1634   : > { %4329 = vpow2.f32 %v3600_v15 }
0x1635   : > { %4331 = vpow2.f32 %v3603_v16 }
0x163a   : > { %v2628_v17 = vpop.f32.mrf.mxu0  ;;  %v2699_v18 = vpop.f32.mrf.mxu1 }
0x163b   : > { %v2700_v20 = vadd.f32 %v5274_v19, %v2699_v18  ;;  %v2629_v38 = vadd.f32 %v5280_v24, %v2628_v17 }
0x163c   : > { %v4126_v21 = vpop.f32.mrf.mxu0  ;;  %v4139_v22 = vpop.f32.mrf.mxu1 }
0x163d   : > { %v3608_v23 = vmul.f32 -1.442695, %v2700_v20 }
0x163f   : > { %4333 = vpow2.f32 %v3608_v23 }
0x1640   : > { %4335 = vtanh.f32 %v2629_v38  ;;  %v5312_v38 = vld [vmem:[%s4732_s26] sm:$0xff] }
0x1641   : > { %v4330_v39 = vpop.eup %4329 }
0x1642   : > { %v4332_v50 = vpop.eup %4331  ;;  %v2483_v27 = vadd.f32 1.0, %v4330_v39  ;;  %v4415_v39 = vmov 4  }
0x1643   : > { %v2559_v25 = vadd.f32 1.0, %v4332_v50  ;;  %4246 = vset.pattern.permute.xlu1 %v4415_v39 }
0x1644   : > { %4337 = vrcp.f32 %v2483_v27 }
0x1645   : > { %4339 = vrcp.f32 %v2559_v25 }
0x164c   : > { %v4334_v30 = vpop.eup %4333 }
0x164d   : > { %v4336_v6 = vpop.eup %4335  ;;  %v2706_v61 = vadd.f32 1.0, %v4334_v30 }
0x164f   : > { %4341 = vrcp.f32 %v2706_v61 }
0x1651   : > { %v4338_v52 = vpop.eup %4337 }
0x1652   : > { %v4340_v9 = vpop.eup %4339  ;;  %v2710_v28 = vmul.f32 %v4338_v52, %v4336_v6 }
0x1653   : > { %v2709_v13 = vmul.f32 %v4340_v9, %v5034_v34 }
0x1655   : > { %v5284_v14 = vadd.f32 %v2710_v28, %v2709_v13 }
0x1657   : > { %4343 = vtanh.f32 %v5284_v14 }
0x165c   : > { %v4342_v15 = vpop.eup %4341 }
0x1664   : > { %v4344_v16 = vpop.eup %4343 }
0x1665   : > { %v2713_v17 = vmul.f32 %v4344_v16, %v4342_v15 }
0x1667   : > { %4147 = vmatmul.mubr.msk.f32.vlgmr.msra.gmra.mxu0 %vm680_vm3, %v2713_v17  ;;  %2907 = vst.msk [vmem:[#allocation2] sm:$0xff] %vm680_vm3, %v2713_v17 }
0x1668   : > { %4170 = vmatpush3.msk.msra.mxu0 %vm363_vm0, %v5042_v40  ;;  %4179 = vmatprep.mubr.msk.f32.mxu0 %vm4408_vm2, %v4407_v2  ;;  %v5305_v40 = vld [vmem:[%s5457_s3] ss:$0 sm:$0xff] }
0x1669   : > { %4171 = vmatprep.subr.mxu0 %v4407_v2 }
0x166a   : > { %4172 = vmatpush3.msra.mxu0 %v5052_v57 }
0x166b   : > { %4173 = vmatprep.subr.mxu0 %v4407_v2 }
0x166c   : > { %4174 = vmatpush3.msra.mxu0 %v5059_v0 }
0x166d   : > { %4175 = vmatprep.subr.mxu0 %v4407_v2 }
0x166e   : > { %4176 = vmatpush3.msra.mxu0 %v5066_v43 }
0x166f   : > { %4177 = vmatprep.subr.mxu0 %v4407_v2 }
0x1670   : > { %4178 = vmatpush3.msra.mxu0 %v5073_v45 }
0x1671   : > { %4195 = vmatprep.subr.mxu0 %v4407_v2 }
0x1727   : > { %v2783_v34 = vpop.f32.mrf.mxu0 }
0x1728   : > { %v2784_v57 = vadd.f32 %v5305_v40, %v2783_v34 }
0x1729   : > { %v4148_v0 = vpop.f32.mrf.mxu0 }
0x172a   : > { %v2787_v18 = vadd.f32 %v2784_v57, %v4701_v11 }
0x172c   : > { %v2788_v43 = vsel %vm755_vm5, %v2787_v18, -inf }
0x172d   : > { %2789 = vmax.xlane.f32.xlu0 %v2788_v43 }
0x17b6   : > { %v2790_v20 = vpop.xlane.xlu0 %2789 }
0x17b7   : > { %v2791_v21 = vsub.f32 %v2787_v18, %v2790_v20 }
0x17b9   : > { %v2792_v45 = vmul.f32 1.442695, %v2791_v21 }
0x17bb   : > { %4345 = vpow2.f32 %v2792_v45 }
0x17c8   : > { %v4346_v22 = vpop.eup %4345 }
0x17c9   : > { %v2794_v23 = vsel %vm755_vm5, %v4346_v22, 0.0 }
0x17ca   : > { %2795 = vadd.xlane.f32.xlu1 %v2794_v23 }
0x17db   : > { %2875 = vperm.xlu1 %4246, %v5312_v38  }
0x1853   : > { %v2796_v50 = vpop.xlane.xlu1 %2795 }
0x1854   : > { %4347 = vrcp.f32 %v2796_v50 }
0x1861   : > { %v4348_v11 = vpop.eup %4347 }
0x1862   : > { %v5315_v27 = vmul.f32 %v4348_v11, %v4346_v22 }
0x1864   : > { %4154 = vmatmul.mubr.msk.f32.vlgmr.msra.gmra.mxu1 %vm755_vm5, %v5315_v27 }
0x1865   : > { %4157 = vmatpush3.msk.msra.mxu1 %vm363_vm0, %v5089_v58  ;;  %4166 = vmatprep.mubr.msk.f32.mxu1 %vm4408_vm2, %v4407_v2  ;;  %v2876_v58 = vpop.permute.xlu1 %2875 }
0x1866   : > { %4158 = vmatprep.subr.mxu1 %v4407_v2 }
0x1867   : > { %4159 = vmatpush3.msra.mxu1 %v5099_v41 }
0x1868   : > { %4160 = vmatprep.subr.mxu1 %v4407_v2 }
0x1869   : > { %4161 = vmatpush3.msra.mxu1 %v5106_v1 }
0x186a   : > { %4162 = vmatprep.subr.mxu1 %v4407_v2 }
0x186b   : > { %4163 = vmatpush3.msra.mxu1 %v5113_v33 }
0x186c   : > { %4164 = vmatprep.subr.mxu1 %v4407_v2 }
0x186d   : > { %4165 = vmatpush3.msra.mxu1 %v5120_v12 }
0x186e   : > { %4182 = vmatprep.subr.mxu1 %v4407_v2 }
0x1924   : > { %v2869_v25 = vpop.f32.mrf.mxu1 }
0x1925   : > { %vm2878_vm11 = vcmp.gt.f32.partialorder %v2869_v25, %v2876_v58 }
0x1926   : > { %v2879_v30 = vsel %vm2878_vm11, %v4692_v60, 12  ;;  %v4155_v41 = vpop.f32.mrf.mxu1 }
0x1927   : > { %v2880_v6 = vsel %vm755_vm5, %v2879_v30, 2147483647 }
0x1928   : > { %v2882_v52 = vshra.s32 %v2880_v6, 16  ;;  %v2881_v9 = vand.u32 65535, %v2880_v6 }
0x192a   : > { %v2884_v1 = vcvt.s32.f32 %v2882_v52  ;;  %v2883_v33 = vcvt.s32.f32 %v2881_v9 }
0x192c   : > { %2885 = vmin.xlane.f32.xlu1 %v2884_v1 }
0x19b5   : > { %v2886_v28 = vpop.xlane.xlu1 %2885 }
0x19b6   : > { %vm2887_vm12 = vcmp.eq.f32.partialorder %v2884_v1, %v2886_v28  ;;  %v2892_v12 = vcvt.f32.s32 %v2886_v28 }
0x19b7   : > { %v2888_v61 = vsel %vm2887_vm12, %v2883_v33, inf }
0x19b8   : > { %2889 = vmin.xlane.f32.xlu0 %v2888_v61  ;;  %v2893_v15 = vshll.u32 %v2892_v12, 16  ;;  %v4416_v12 = vmov 5  }
0x19b9   : > { %4247 = vset.pattern.permute.xlu1 %v4416_v12  ;;  %4248 = vset.pattern.permute.xlu0 %v4416_v12 }
0x1a41   : > { %v2890_v13 = vpop.xlane.xlu0 %2889 }
0x1a42   : > { %v2891_v16 = vcvt.f32.s32 %v2890_v13 }
0x1a44   : > { %v2894_v17 = vadd.s32 %v2893_v15, %v2891_v16 }
0x1a46   : > { %vm2895_vm4 = vcmp.eq.s32.totalorder %v2894_v17, 12 }
0x1a47   : > { %v2896_v34 = vsel %vm2895_vm4, 7, %v2894_v17 }
0x1a48   : > { %vm2897_vm7 = vcmp.eq.s32.totalorder %v4692_v60, %v2896_v34  ;;  %v5339_v57 = vsel %vm2904_vm13, %v2896_v34, %v5131_v26 }
0x1a49   : > { %v5342_v0 = vsel %vm2897_vm7, 1.0, %v4407_v2 }
0x1a4a   : > { %2909 = vrot.lane.b32.xlu0 %v5342_v0, %s4411_s25 }
0x1abc   : > { %v2910_v18 = vpop.permute.xlu0 %2909 }
0x1abd   : > { %2912 = vst.msk [vmem:[#allocation2] sm:$0xff] %vm883_vm10, %v2910_v18 }
0x1ac4   : > { %v2913_v43 = vld [vmem:[#allocation2] sm:$0xff] }
0x1ac5   : > { %4167 = vmatmul.mubr.msk.f32.vlgmr.msra.gmra.mxu1 %vm357_vm1, %v2913_v43  ;;  %4180 = vmatmul.mubr.msk.f32.vlgmr.msra.gmra.mxu0 %vm357_vm1, %v2913_v43 }
0x1ac6   : > { %4183 = vmatpush3.msk.msra.mxu1 %vm363_vm0, %v5144_v31  ;;  %4196 = vmatpush3.msk.msra.mxu0 %vm363_vm0, %v5151_v59 }
0x1ac7   : > { %4184 = vmatprep.subr.mxu1 %v4407_v2  ;;  %4197 = vmatprep.subr.mxu0 %v4407_v2 }
0x1ac8   : > { %4185 = vmatpush3.msra.mxu1 %v5160_v32  ;;  %4198 = vmatpush3.msra.mxu0 %v5166_v8 }
0x1ac9   : > { %4186 = vmatprep.subr.mxu1 %v4407_v2  ;;  %4199 = vmatprep.subr.mxu0 %v4407_v2 }
0x1aca   : > { %4187 = vmatpush3.msra.mxu1 %v5174_v35  ;;  %4200 = vmatpush3.msra.mxu0 %v5180_v36 }
0x1acb   : > { %4188 = vmatprep.subr.mxu1 %v4407_v2  ;;  %4201 = vmatprep.subr.mxu0 %v4407_v2 }
0x1acc   : > { %4189 = vmatpush3.msra.mxu1 %v5188_v10  ;;  %4202 = vmatpush3.msra.mxu0 %v5194_v37 }
0x1acd   : > { %4190 = vmatprep.subr.mxu1 %v4407_v2  ;;  %4203 = vmatprep.subr.mxu0 %v4407_v2 }
0x1ace   : > { %4191 = vmatpush3.msra.mxu1 %v5202_v3  ;;  %4192 = vmatprep.mubr.msk.f32.mxu1 %vm4408_vm2, %v4407_v2 }
0x1acf   : > { %4204 = vmatpush3.msra.mxu0 %v5210_v46  ;;  %4205 = vmatprep.mubr.msk.f32.mxu0 %vm4408_vm2, %v4407_v2 }
0x1ad0   : > { %4193 = vmatmul.mubr.msk.f32.vlgmr.msra.gmra.mxu1 %vm357_vm1, %v2913_v43  ;;  %4206 = vmatmul.mubr.msk.f32.vlgmr.msra.gmra.mxu0 %vm357_vm1, %v2913_v43 }
0x1ad1   : > { %4208 = vmatprep.subr.mxu1 %v4407_v2  ;;  %4214 = vmatprep.mubr.msk.f32.mxu1 %vm4408_vm2, %v4407_v2 }
0x1ad2   : > { %4209 = vmatpush3.msra.mxu1 %v5223_v47  ;;  %4217 = vmatprep.subr.mxu0 %v4407_v2 }
0x1ad3   : > { %4210 = vmatprep.subr.mxu1 %v4407_v2  ;;  %4218 = vmatpush3.msk.msra.mxu0 %vm363_vm0, %v5231_v5 }
0x1ad4   : > { %4211 = vmatpush3.msra.mxu1 %v5238_v48  ;;  %4219 = vmatprep.subr.mxu0 %v4407_v2 }
0x1ad5   : > { %4212 = vmatprep.subr.mxu1 %v4407_v2  ;;  %4220 = vmatpush3.msra.mxu0 %v5246_v49 }
0x1ad6   : > { %4213 = vmatpush3.msra.mxu1 %v5252_v7  ;;  %4221 = vmatprep.mubr.msk.f32.mxu0 %vm4408_vm2, %v4407_v2  ;;  %vm3411_vm2 = vcmp.eq.s32.totalorder %v4692_v60, 5 }
0x1b85   : > { %v2983_v26 = vpop.f32.mrf.mxu1  ;;  %v3059_v31 = vpop.f32.mrf.mxu0 }
0x1b86   : > { %v2984_v59 = vadd.f32 %v5262_v53, %v2983_v26  ;;  %v3060_v32 = vadd.f32 %v5268_v63, %v3059_v31 }
0x1b87   : > { %v4168_v8 = vpop.f32.mrf.mxu1  ;;  %v4181_v35 = vpop.f32.mrf.mxu0 }
0x1b88   : > { %v3615_v36 = vmul.f32 -1.442695, %v2984_v59  ;;  %v3618_v10 = vmul.f32 -1.442695, %v3060_v32  ;;  %v871_v8 = vmul.f32 %v4762_v29, %v4738_v44  ;;  %v2900_v29 = vmul.f32 %v5342_v0, %v5315_v27 }
0x1b8a   : > { %4349 = vpow2.f32 %v3615_v36  ;;  %v872_v35 = vsel %vm755_vm5, %v871_v8, 0.0  ;;  %v1379_v36 = vmul.f32 %v4874_v51, %v4844_v56  ;;  %v2901_v56 = vsel %vm755_vm5, %v2900_v29, 0.0 }
0x1b8b   : > { %4351 = vpow2.f32 %v3618_v10 }
0x1b8c   : > { %v1380_v10 = vsel %vm755_vm5, %v1379_v36, 0.0 }
0x1b90   : > { %v3135_v37 = vpop.f32.mrf.mxu1  ;;  %v3206_v3 = vpop.f32.mrf.mxu0 }
0x1b91   : > { %v3207_v46 = vadd.f32 %v5274_v19, %v3206_v3  ;;  %v3136_v49 = vadd.f32 %v5280_v24, %v3135_v37  ;;  %v1886_v37 = vmul.f32 %v4979_v62, %v4952_v55 }
0x1b92   : > { %v4194_v47 = vpop.f32.mrf.mxu1  ;;  %v4207_v5 = vpop.f32.mrf.mxu0 }
0x1b93   : > { %v3623_v48 = vmul.f32 -1.442695, %v3207_v46  ;;  %v1887_v3 = vsel %vm755_vm5, %v1886_v37, 0.0  ;;  %v2393_v46 = vmul.f32 %v5134_v4, %v5082_v54 }
0x1b95   : > { %4353 = vpow2.f32 %v3623_v48  ;;  %v2394_v44 = vsel %vm755_vm5, %v2393_v46, 0.0 }
0x1b96   : > { %4355 = vtanh.f32 %v3136_v49 }
0x1b97   : > { %v4350_v7 = vpop.eup %4349 }
0x1b98   : > { %v4352_v20 = vpop.eup %4351  ;;  %v2990_v53 = vadd.f32 1.0, %v4350_v7 }
0x1b99   : > { %v3066_v63 = vadd.f32 1.0, %v4352_v20 }
0x1b9a   : > { %4357 = vrcp.f32 %v2990_v53 }
0x1b9b   : > { %4359 = vrcp.f32 %v3066_v63 }
0x1ba2   : > { %v4354_v21 = vpop.eup %4353 }
0x1ba3   : > { %v4356_v45 = vpop.eup %4355  ;;  %v3213_v50 = vadd.f32 1.0, %v4354_v21 }
0x1ba5   : > { %4361 = vrcp.f32 %v3213_v50 }
0x1ba7   : > { %v4358_v22 = vpop.eup %4357 }
0x1ba8   : > { %v4360_v23 = vpop.eup %4359  ;;  %v3217_v39 = vmul.f32 %v4358_v22, %v4356_v45 }
0x1ba9   : > { %v3216_v19 = vmul.f32 %v4360_v23, %v5284_v14 }
0x1bab   : > { %v3218_v11 = vadd.f32 %v3217_v39, %v3216_v19 }
0x1bad   : > { %4363 = vtanh.f32 %v3218_v11 }
0x1bb2   : > { %v4362_v24 = vpop.eup %4361 }
0x1bba   : > { %v4364_v58 = vpop.eup %4363 }
0x1bbb   : > { %v3220_v25 = vmul.f32 %v4364_v58, %v4362_v24 }
0x1bbd   : > { %4215 = vmatmul.mubr.msk.f32.vlgmr.msra.gmra.mxu1 %vm680_vm3, %v3220_v25  ;;  %3414 = vst.msk [vmem:[#allocation2] sm:$0xff] %vm680_vm3, %v3220_v25 }
0x1c7d   : > { %v3290_v30 = vpop.f32.mrf.mxu1 }
0x1c7e   : > { %v3291_v41 = vadd.f32 %v5305_v40, %v3290_v30 }
0x1c7f   : > { %v4216_v6 = vpop.f32.mrf.mxu1 }
0x1c80   : > { %v3294_v52 = vadd.f32 %v3291_v41, %v4837_v42 }
0x1c82   : > { %v3295_v1 = vsel %vm755_vm5, %v3294_v52, -inf }
0x1c83   : > { %3296 = vmax.xlane.f32.xlu0 %v3295_v1 }
0x1d0c   : > { %v3297_v14 = vpop.xlane.xlu0 %3296 }
0x1d0d   : > { %v3298_v9 = vsub.f32 %v3294_v52, %v3297_v14 }
0x1d0f   : > { %v3299_v28 = vmul.f32 1.442695, %v3298_v9 }
0x1d11   : > { %4365 = vpow2.f32 %v3299_v28 }
0x1d1e   : > { %v4366_v33 = vpop.eup %4365 }
0x1d1f   : > { %v3301_v61 = vsel %vm755_vm5, %v4366_v33, 0.0 }
0x1d20   : > { %3302 = vadd.xlane.f32.xlu1 %v3301_v61 }
0x1d31   : > { %3382 = vperm.xlu1 %4247, %v5312_v38  }
0x1da9   : > { %v3303_v40 = vpop.xlane.xlu1 %3302 }
0x1daa   : > { %4367 = vrcp.f32 %v3303_v40 }
0x1dad   : > { %v3383_v15 = vpop.permute.xlu1 %3382 }
0x1db7   : > { %v4368_v13 = vpop.eup %4367 }
0x1db8   : > { %v3305_v42 = vmul.f32 %v4368_v13, %v4366_v33 }
0x1dba   : > { %4222 = vmatmul.mubr.msk.f32.vlgmr.msra.gmra.mxu0 %vm755_vm5, %v3305_v42 }
0x1e7a   : > { %v3376_v16 = vpop.f32.mrf.mxu0 }
0x1e7b   : > { %vm3385_vm0 = vcmp.gt.f32.partialorder %v3376_v16, %v3383_v15 }
0x1e7c   : > { %v3386_v17 = vsel %vm3385_vm0, %v4692_v60, 12  ;;  %v4223_v34 = vpop.f32.mrf.mxu0 }
0x1e7d   : > { %v3387_v18 = vsel %vm755_vm5, %v3386_v17, 2147483647 }
0x1e7e   : > { %v3389_v43 = vshra.s32 %v3387_v18, 16  ;;  %v3388_v31 = vand.u32 65535, %v3387_v18 }
0x1e80   : > { %v3391_v26 = vcvt.s32.f32 %v3389_v43  ;;  %v3390_v38 = vcvt.s32.f32 %v3388_v31 }
0x1e82   : > { %3392 = vmin.xlane.f32.xlu1 %v3391_v26 }
0x1f0b   : > { %v3393_v59 = vpop.xlane.xlu1 %3392 }
0x1f0c   : > { %vm3394_vm1 = vcmp.eq.f32.partialorder %v3391_v26, %v3393_v59  ;;  %v3399_v51 = vcvt.f32.s32 %v3393_v59 }
0x1f0d   : > { %v3395_v32 = vsel %vm3394_vm1, %v3390_v38, inf }
0x1f0e   : > { %3396 = vmin.xlane.f32.xlu0 %v3395_v32  ;;  %v3400_v55 = vshll.u32 %v3399_v51, 16 }
0x1f12   : > { %873 = vadd.xlane.f32.xlu0 %v872_v35 }
0x1f16   : > { %1381 = vadd.xlane.f32.xlu0 %v1380_v10 }
0x1f1a   : > { %1888 = vadd.xlane.f32.xlu0 %v1887_v3 }
0x1f1e   : > { %2395 = vadd.xlane.f32.xlu0 %v2394_v44 }
0x1f22   : > { %2902 = vadd.xlane.f32.xlu0 %v2901_v56 }
0x1f97   : > { %v3397_v47 = vpop.xlane.xlu0 %3396 }
0x1f98   : > { %v3398_v62 = vcvt.f32.s32 %v3397_v47 }
0x1f9a   : > { %v3401_v5 = vadd.s32 %v3400_v55, %v3398_v62 }
0x1f9b   : > { %v874_v49 = vpop.xlane.xlu0 %873 }
0x1f9c   : > { %vm3402_vm3 = vcmp.eq.s32.totalorder %v3401_v5, 12  ;;  %v876_v63 = vsel %vm875_vm14, %v874_v49, 0.0 }
0x1f9d   : > { %v3403_v54 = vsel %vm3402_vm3, 11, %v3401_v5 }
0x1f9e   : > { %vm3404_vm11 = vcmp.eq.s32.totalorder %v4692_v60, %v3403_v54  ;;  %v3413_v4 = vsel %vm3411_vm2, %v3403_v54, %v5339_v57 }
0x1f9f   : > { %v3627_v27 = vsel %vm3404_vm11, 1.0, %v4407_v2  ;;  %3422 = vst.msk [vmem:[%s284_s8] sm:$0xff] %vm3420_vm8, %v3413_v4  ;;  %v1382_v7 = vpop.xlane.xlu0 %1381 }
0x1fa0   : > { %v3407_v0 = vmul.f32 %v3627_v27, %v3305_v42  ;;  %v1384_v57 = vsel %vm1383_vm15, %v1382_v7, %v876_v63 }
0x1fa2   : > { %v3408_v48 = vsel %vm755_vm5, %v3407_v0, 0.0 }
0x1fa3   : > { %3409 = vadd.xlane.f32.xlu0 %v3408_v48  ;;  %v1889_v20 = vpop.xlane.xlu0 %1888 }
0x1fa4   : > { %v1891_v2 = vsel %vm1890_vm9, %v1889_v20, %v1384_v57 }
0x1fa7   : > { %v2396_v53 = vpop.xlane.xlu0 %2395 }
0x1fa8   : > { %v2398_v45 = vsel %vm2397_vm6, %v2396_v53, %v1891_v2 }
0x1fab   : > { %v2903_v21 = vpop.xlane.xlu0 %2902 }
0x1fac   : > { %v2905_v22 = vsel %vm2904_vm13, %v2903_v21, %v2398_v45 }
0x1fb9   : > { %3416 = vrot.lane.b32.xlu0 %v3627_v27, %s4411_s25  ;;  %s280_s25 = scalar_lea.vmem %s5460_s6, %s4726_s21 }
0x202c   : > { %v3410_v23 = vpop.xlane.xlu0 %3409 }
0x202d   : > { %v3412_v39 = vsel %vm3411_vm2, %v3410_v23, %v2905_v22 }
0x202e   : > { %3421 = vst.msk [vmem:[%s280_s25] sm:$0xff] %vm3420_vm8, %v3412_v39 }
0x2030   : > { %v3417_v50 = vpop.permute.xlu0 %3416 }
0x2031   : > { %3419 = vst.msk [vmem:[#allocation2] sm:$0xff] %vm883_vm10, %v3417_v50 }
0x2032 PF: > { %s18_s24 = sadd.s32 1, %s4405_s24  }
0x2033   : > { %p15_p4 = scmp.ge.s32.totalorder %s18_s24, 4  }
0x2035   :  { %17 = sbr.rel (!%p15_p4) target bundleno = 1 (0x1), region = 92 }

</bundles_post_ra>
